<compile_context>
chip_gen: v7x
topology: tpu7x:2x2x1
jax: 0.10.0
libtpu: 0.0.40
codegen_flags: <defaults>
</compile_context>

<pallas_src>
import functools

import jax
import jax.numpy as jnp
from jax.experimental import pallas as pl
from jax.experimental.pallas import tpu as pltpu


def _round_up(x, m):
    return (x + m - 1) // m * m


# ----------------------------------------------------------------------------
# ONE fused kernel: conv3x3(+bias,+ReLU) -> GAP -> all branch MLPs -> logits
# ----------------------------------------------------------------------------

def fused_forward_kernel(lhs_ref, cw_ref, cb_ref, w1_ref, b1_ref, w2_ref,
                         b2_ref, o_ref, *, inv_hw):
    # lhs_ref: (H*W, K_pad)   bf16  lane-dense im2col'd pixels of ONE image
    # cw_ref:  (K_pad, F)     bf16  conv3x3 weights, tap-major, K zero-padded
    # cb_ref:  (1, F)         f32   conv bias
    # w1_ref:  (F, L*512)     bf16  fused first-layer branch weights
    # b1_ref:  (1, L*512)     f32
    # w2_ref:  (L*512, Cpad)  bf16  block-diagonal second-layer branch weights
    # b2_ref:  (1, Cpad)      f32
    # o_ref:   (1, Cpad)      f32   concatenated per-level logits for this image

    # conv3x3 as a single K=9C MXU matmul (no per-tap dots / relayouts).
    conv = jnp.dot(lhs_ref[...], cw_ref[...],
                   preferred_element_type=jnp.float32)            # (HW, F) f32
    act = jnp.maximum(conv + cb_ref[...], 0.0)                    # bias + ReLU
    feat = jnp.sum(act, axis=0, keepdims=True) * inv_hw           # GAP -> (1, F)

    # Hierarchical branches (all levels fused): Linear -> ReLU -> Linear.
    hidden = jnp.dot(feat.astype(jnp.bfloat16), w1_ref[...],
                     preferred_element_type=jnp.float32)          # (1, L*512)
    hidden = jnp.maximum(hidden + b1_ref[...], 0.0)
    # Dropout(p=0.5) is identity at inference (eval mode).
    # TODO(synk): training-mode dropout (Bernoulli mask + 1/(1-p) scaling)
    #             via pltpu.prng_seed / pltpu.prng_random_bits.
    o_ref[...] = (jnp.dot(hidden.astype(jnp.bfloat16), w2_ref[...],
                          preferred_element_type=jnp.float32)
                  + b2_ref[...])                                   # (1, Cpad)


def pallas_fused_forward(lhs, conv_w, conv_b, w1, b1, w2, b2, *, hw):
    # lhs: (N, H*W, K_pad) bf16
    n, pix, k_pad = lhs.shape
    f_out = conv_w.shape[1]
    h_cat = w1.shape[1]
    c_pad = w2.shape[1]

    kernel = functools.partial(fused_forward_kernel, inv_hw=1.0 / float(hw))

    flops = n * (2 * pix * k_pad * f_out
                 + 2 * f_out * h_cat
                 + 2 * h_cat * c_pad)
    bytes_accessed = (lhs.size * lhs.dtype.itemsize
                      + conv_w.size * conv_w.dtype.itemsize
                      + w1.size * w1.dtype.itemsize
                      + w2.size * w2.dtype.itemsize
                      + (conv_b.size + b1.size + b2.size) * 4
                      + n * c_pad * 4)

    out = pl.pallas_call(
        kernel,
        out_shape=jax.ShapeDtypeStruct((n, 1, c_pad), jnp.float32),
        grid=(n,),
        in_specs=[
            pl.BlockSpec((None, pix, k_pad), lambda i: (i, 0, 0)),   # per-image LHS
            pl.BlockSpec((k_pad, f_out), lambda i: (0, 0)),          # conv weights
            pl.BlockSpec((1, f_out), lambda i: (0, 0)),              # conv bias
            pl.BlockSpec((f_out, h_cat), lambda i: (0, 0)),          # branch W1
            pl.BlockSpec((1, h_cat), lambda i: (0, 0)),              # branch b1
            pl.BlockSpec((h_cat, c_pad), lambda i: (0, 0)),          # branch W2 (blkdiag)
            pl.BlockSpec((1, c_pad), lambda i: (0, 0)),              # branch b2
        ],
        out_specs=pl.BlockSpec((None, 1, c_pad), lambda i: (i, 0, 0)),
        compiler_params=pltpu.CompilerParams(
            dimension_semantics=("parallel",)),   # batch sharded across TCs (v7x)
        cost_estimate=pl.CostEstimate(
            flops=flops, transcendentals=0, bytes_accessed=bytes_accessed),
    )(lhs, conv_w, conv_b, w1, b1, w2, b2)
    return out[:, 0, :]                                             # (N, Cpad)


# ----------------------------------------------------------------------------
# Model wrapper (plain-JAX glue: parameter packing + lane-dense im2col layout)
# ----------------------------------------------------------------------------

class HierarchicalInsectClassifierPallas:
    """JAX/Pallas port of HierarchicalInsectClassifier (eval-mode forward)."""

    def __init__(self, num_classes_per_level, in_channels=4,
                 backbone_output_features=128, branch_hidden=512, seed=0):
        self.num_levels = len(num_classes_per_level)
        self.num_classes_per_level = list(num_classes_per_level)
        self.branch_hidden = branch_hidden
        self.backbone_output_features = backbone_output_features
        self.in_channels = in_channels

        f_out = backbone_output_features
        c_in = in_channels
        key = jax.random.PRNGKey(seed)
        keys = jax.random.split(key, 2 + 4 * self.num_levels)

        # Synthetic backbone-stage weights, tap-major (9, C, F) -> (9*C, F),
        # K zero-padded to a lane multiple for a single lane-dense MXU matmul.
        conv_w = (jax.random.normal(keys[0], (9, c_in, f_out), jnp.float32)
                  * (1.0 / jnp.sqrt(9.0 * c_in))).reshape(9 * c_in, f_out)
        self.k_pad = _round_up(9 * c_in, 128)
        self.conv_w = (jnp.zeros((self.k_pad, f_out), jnp.float32)
                       .at[:9 * c_in].set(conv_w)).astype(jnp.bfloat16)
        self.conv_b = jnp.zeros((1, f_out), jnp.float32)

        # Fuse all branch MLPs: wide first layer + block-diagonal second layer,
        # class dim zero-padded to 128 lanes (lane-dense output store).
        lvls = self.num_levels
        h_cat = lvls * branch_hidden
        total = sum(self.num_classes_per_level)
        c_pad = _round_up(max(total, 1), 128)

        w1_cat = jnp.zeros((f_out, h_cat), jnp.float32)
        b1_cat = jnp.zeros((1, h_cat), jnp.float32)
        w2_blk = jnp.zeros((h_cat, c_pad), jnp.float32)
        b2_cat = jnp.zeros((1, c_pad), jnp.float32)
        offsets, off = [], 0
        for lvl, nc in enumerate(self.num_classes_per_level):
            k1, k2, k3, k4 = keys[2 + 4 * lvl: 2 + 4 * (lvl + 1)]
            w1 = jax.random.normal(k1, (f_out, branch_hidden), jnp.float32) / jnp.sqrt(float(f_out))
            b1 = jax.random.normal(k2, (1, branch_hidden), jnp.float32) * 0.01
            w2 = jax.random.normal(k3, (branch_hidden, nc), jnp.float32) / jnp.sqrt(float(branch_hidden))
            b2 = jax.random.normal(k4, (1, nc), jnp.float32) * 0.01
            hs = lvl * branch_hidden
            w1_cat = w1_cat.at[:, hs:hs + branch_hidden].set(w1)
            b1_cat = b1_cat.at[:, hs:hs + branch_hidden].set(b1)
            w2_blk = w2_blk.at[hs:hs + branch_hidden, off:off + nc].set(w2)
            b2_cat = b2_cat.at[:, off:off + nc].set(b2)
            offsets.append(off)
            off += nc
        # bf16 branch weights -> single-pass MXU matmuls, half the weight DMA.
        self.w1_cat = w1_cat.astype(jnp.bfloat16)
        self.w2_blk = w2_blk.astype(jnp.bfloat16)
        self.b1_cat, self.b2_cat = b1_cat, b2_cat
        self.class_offsets = offsets

        # registered buffers (unused by forward, kept for module fidelity)
        self.class_means = jnp.zeros((total,), jnp.float32)
        self.class_stds = jnp.ones((total,), jnp.float32)

    def forward(self, x_nchw):
        x = jnp.transpose(x_nchw, (0, 2, 3, 1)).astype(jnp.float32)   # NCHW -> NHWC
        n, h, w, c = x.shape

        # Lane-dense im2col LHS: (N, H*W, 9*C) zero-padded in K to k_pad, bf16.
        # Tap order (di, dj) row-major to match the tap-major conv weights.
        xp = jnp.pad(x, ((0, 0), (1, 1), (1, 1), (0, 0)))
        taps = [xp[:, di:di + h, dj:dj + w, :]
                for di in range(3) for dj in range(3)]
        lhs = jnp.concatenate(taps, axis=-1).reshape(n, h * w, 9 * c)
        lhs = jnp.pad(lhs, ((0, 0), (0, 0), (0, self.k_pad - 9 * c)))
        lhs = lhs.astype(jnp.bfloat16)

        # One fused pallas_call: conv+ReLU+GAP -> all branch MLPs -> logits.
        logits = pallas_fused_forward(
            lhs, self.conv_w, self.conv_b, self.w1_cat, self.b1_cat,
            self.w2_blk, self.b2_cat, hw=h * w)                      # (N, Cpad)

        outputs = []
        for off, nc in zip(self.class_offsets, self.num_classes_per_level):
            outputs.append(logits[:, off:off + nc])
        return outputs

    __call__ = forward


if __name__ == "__main__":
    num_classes_per_level = [4, 8, 16]          # e.g. order / family / genus
    model = HierarchicalInsectClassifierPallas(
        num_classes_per_level, in_channels=4,
        backbone_output_features=128, branch_hidden=512, seed=0)

    key = jax.random.PRNGKey(0)
    x = jax.random.normal(key, (2, 4, 16, 16), jnp.float32)   # NCHW, like PyTorch

    outputs = model(x)
    for o in outputs:
        jax.block_until_ready(o)

    expected_shapes = [(2, nc) for nc in num_classes_per_level]
    assert [tuple(o.shape) for o in outputs] == expected_shapes, \
        f"got {[o.shape for o in outputs]}, want {expected_shapes}"
    print("KERNEL_OK")
</pallas_src>

<mosaic_0001>
module attributes {stable_mosaic.version = 11 : i64} {
  func.func @fused_forward_kernel(%arg0: i32, %arg1: memref<1x256x128xbf16, #tpu.memory_space<vmem>>, %arg2: memref<128x128xbf16, #tpu.memory_space<vmem>>, %arg3: memref<1x128xf32, #tpu.memory_space<vmem>>, %arg4: memref<128x1536xbf16, #tpu.memory_space<vmem>>, %arg5: memref<1x1536xf32, #tpu.memory_space<vmem>>, %arg6: memref<1536x128xbf16, #tpu.memory_space<vmem>>, %arg7: memref<1x128xf32, #tpu.memory_space<vmem>>, %arg8: memref<1x1x128xf32, #tpu.memory_space<vmem>>) attributes {dimension_semantics = [#tpu.dimension_semantics<parallel>], iteration_bounds = array<i64: 2>, scalar_prefetch = 0 : i64, scratch_operands = 0 : i64, tpu.core_type = #tpu.core_type<tc>, window_params = [{transform_indices = @transform_0, window_bounds = array<i64: 1, 256, 128>}, {pipeline_mode = #tpu.pipeline_mode<synchronous>, transform_indices = @transform_1, window_bounds = array<i64: 128, 128>}, {pipeline_mode = #tpu.pipeline_mode<synchronous>, transform_indices = @transform_2, window_bounds = array<i64: 1, 128>}, {pipeline_mode = #tpu.pipeline_mode<synchronous>, transform_indices = @transform_3, window_bounds = array<i64: 128, 1536>}, {pipeline_mode = #tpu.pipeline_mode<synchronous>, transform_indices = @transform_4, window_bounds = array<i64: 1, 1536>}, {pipeline_mode = #tpu.pipeline_mode<synchronous>, transform_indices = @transform_5, window_bounds = array<i64: 1536, 128>}, {pipeline_mode = #tpu.pipeline_mode<synchronous>, transform_indices = @transform_6, window_bounds = array<i64: 1, 128>}, {transform_indices = @transform_7, window_bounds = array<i64: 1, 1, 128>}]} {
    %c0 = arith.constant 0 : index
    %c0_0 = arith.constant 0 : index
    %c0_1 = arith.constant 0 : index
    %0 = vector.load %arg1[%c0, %c0_0, %c0_1] : memref<1x256x128xbf16, #tpu.memory_space<vmem>>, vector<1x256x128xbf16>
    %1 = vector.shape_cast %0 : vector<1x256x128xbf16> to vector<256x128xbf16>
    %c0_2 = arith.constant 0 : index
    %c0_3 = arith.constant 0 : index
    %2 = vector.load %arg2[%c0_2, %c0_3] : memref<128x128xbf16, #tpu.memory_space<vmem>>, vector<128x128xbf16>
    %cst = arith.constant dense<0.000000e+00> : vector<256x128xf32>
    %3 = tpu.matmul %1, %2, %cst {dimension_numbers = #tpu.dot_dimension_numbers<[1], [0], [0], [1], [0, 0, 1, 1], [], []>} : vector<256x128xbf16>, vector<128x128xbf16>, vector<256x128xf32> -> vector<256x128xf32>
    %c0_4 = arith.constant 0 : index
    %c0_5 = arith.constant 0 : index
    %4 = vector.load %arg3[%c0_4, %c0_5] : memref<1x128xf32, #tpu.memory_space<vmem>>, vector<1x128xf32>
    %5 = vector.broadcast %4 : vector<1x128xf32> to vector<256x128xf32>
    %6 = arith.addf %3, %5 : vector<256x128xf32>
    %cst_6 = arith.constant 0.000000e+00 : f32
    %7 = vector.broadcast %cst_6 : f32 to vector<256x128xf32>
    %8 = arith.maximumf %6, %7 : vector<256x128xf32>
    %cst_7 = arith.constant dense<0.000000e+00> : vector<128xf32>
    %9 = vector.multi_reduction <add>, %8, %cst_7 [0] : vector<256x128xf32> to vector<128xf32>
    %10 = vector.shape_cast %9 : vector<128xf32> to vector<1x128xf32>
    %cst_8 = arith.constant 3.906250e-03 : f32
    %11 = vector.broadcast %cst_8 : f32 to vector<1x128xf32>
    %12 = arith.mulf %10, %11 : vector<1x128xf32>
    %13 = arith.truncf %12 : vector<1x128xf32> to vector<1x128xbf16>
    %c0_9 = arith.constant 0 : index
    %c0_10 = arith.constant 0 : index
    %14 = vector.load %arg4[%c0_9, %c0_10] : memref<128x1536xbf16, #tpu.memory_space<vmem>>, vector<128x1536xbf16>
    %cst_11 = arith.constant dense<0.000000e+00> : vector<1x1536xf32>
    %15 = tpu.matmul %13, %14, %cst_11 {dimension_numbers = #tpu.dot_dimension_numbers<[1], [0], [0], [1], [0, 0, 1, 1], [], []>} : vector<1x128xbf16>, vector<128x1536xbf16>, vector<1x1536xf32> -> vector<1x1536xf32>
    %c0_12 = arith.constant 0 : index
    %c0_13 = arith.constant 0 : index
    %16 = vector.load %arg5[%c0_12, %c0_13] : memref<1x1536xf32, #tpu.memory_space<vmem>>, vector<1x1536xf32>
    %17 = arith.addf %15, %16 : vector<1x1536xf32>
    %cst_14 = arith.constant 0.000000e+00 : f32
    %18 = vector.broadcast %cst_14 : f32 to vector<1x1536xf32>
    %19 = arith.maximumf %17, %18 : vector<1x1536xf32>
    %20 = arith.truncf %19 : vector<1x1536xf32> to vector<1x1536xbf16>
    %c0_15 = arith.constant 0 : index
    %c0_16 = arith.constant 0 : index
    %21 = vector.load %arg6[%c0_15, %c0_16] : memref<1536x128xbf16, #tpu.memory_space<vmem>>, vector<1536x128xbf16>
    %cst_17 = arith.constant dense<0.000000e+00> : vector<1x128xf32>
    %22 = tpu.matmul %20, %21, %cst_17 {dimension_numbers = #tpu.dot_dimension_numbers<[1], [0], [0], [1], [0, 0, 1, 1], [], []>} : vector<1x1536xbf16>, vector<1536x128xbf16>, vector<1x128xf32> -> vector<1x128xf32>
    %c0_18 = arith.constant 0 : index
    %c0_19 = arith.constant 0 : index
    %23 = vector.load %arg7[%c0_18, %c0_19] : memref<1x128xf32, #tpu.memory_space<vmem>>, vector<1x128xf32>
    %24 = arith.addf %22, %23 : vector<1x128xf32>
    %c0_20 = arith.constant 0 : index
    %c0_21 = arith.constant 0 : index
    %c0_22 = arith.constant 0 : index
    %25 = vector.load %arg8[%c0_20, %c0_21, %c0_22] : memref<1x1x128xf32, #tpu.memory_space<vmem>>, vector<1x1x128xf32>
    %26 = vector.shape_cast %25 : vector<1x1x128xf32> to vector<1x128xf32>
    %27 = vector.shape_cast %24 : vector<1x128xf32> to vector<1x1x128xf32>
    tpu.vector_store %arg8[%c0_20, %c0_21, %c0_22], %27 {strides = array<i32>} : memref<1x1x128xf32, #tpu.memory_space<vmem>>, vector<1x1x128xf32>,
    return
  }
  func.func @transform_0(%arg0: i32) -> (i32, i32, i32) {
    %c0_i32 = arith.constant 0 : i32
    %c0_i32_0 = arith.constant 0 : i32
    %c0_i32_1 = arith.constant 0 : i32
    return %arg0, %c0_i32, %c0_i32_0 : i32, i32, i32
  }
  func.func @transform_1(%arg0: i32) -> (i32, i32) {
    %c0_i32 = arith.constant 0 : i32
    %c0_i32_0 = arith.constant 0 : i32
    %c0_i32_1 = arith.constant 0 : i32
    return %c0_i32, %c0_i32_0 : i32, i32
  }
  func.func @transform_2(%arg0: i32) -> (i32, i32) {
    %c0_i32 = arith.constant 0 : i32
    %c0_i32_0 = arith.constant 0 : i32
    %c0_i32_1 = arith.constant 0 : i32
    return %c0_i32, %c0_i32_0 : i32, i32
  }
  func.func @transform_3(%arg0: i32) -> (i32, i32) {
    %c0_i32 = arith.constant 0 : i32
    %c0_i32_0 = arith.constant 0 : i32
    %c0_i32_1 = arith.constant 0 : i32
    return %c0_i32, %c0_i32_0 : i32, i32
  }
  func.func @transform_4(%arg0: i32) -> (i32, i32) {
    %c0_i32 = arith.constant 0 : i32
    %c0_i32_0 = arith.constant 0 : i32
    %c0_i32_1 = arith.constant 0 : i32
    return %c0_i32, %c0_i32_0 : i32, i32
  }
  func.func @transform_5(%arg0: i32) -> (i32, i32) {
    %c0_i32 = arith.constant 0 : i32
    %c0_i32_0 = arith.constant 0 : i32
    %c0_i32_1 = arith.constant 0 : i32
    return %c0_i32, %c0_i32_0 : i32, i32
  }
  func.func @transform_6(%arg0: i32) -> (i32, i32) {
    %c0_i32 = arith.constant 0 : i32
    %c0_i32_0 = arith.constant 0 : i32
    %c0_i32_1 = arith.constant 0 : i32
    return %c0_i32, %c0_i32_0 : i32, i32
  }
  func.func @transform_7(%arg0: i32) -> (i32, i32, i32) {
    %c0_i32 = arith.constant 0 : i32
    %c0_i32_0 = arith.constant 0 : i32
    %c0_i32_1 = arith.constant 0 : i32
    return %arg0, %c0_i32, %c0_i32_0 : i32, i32, i32
  }
}

</mosaic_0001>

<bundles_post_ra>
// kernel: tpu_custom_call.1
= control target key start
LH: loop header
LB: loop body
LE: loop exit
PB: predicated region body
PF: predicated region fallthrough
CT: control target
= control target key end

     0   :  { %s4204_s0 = inlined_call_operand.hbm [shape: bf16[2,256,128], index: 0, kind: input, shape index: {}]   ;;  %s4205_s1 = inlined_call_operand.hbm [shape: bf16[128,128], index: 1, kind: input, shape index: {}]   ;;  %s4206_s2 = inlined_call_operand.vmem [shape: f32[1,128], index: 2, kind: input, shape index: {}]   ;;  %s4207_s3 = inlined_call_operand.hbm [shape: bf16[128,1536], index: 3, kind: input, shape index: {}]   ;;  %s4208_s4 = inlined_call_operand.vmem [shape: f32[1,1536], index: 4, kind: input, shape index: {}]   ;;  %s4209_s5 = inlined_call_operand.hbm [shape: bf16[1536,128], index: 5, kind: input, shape index: {}]   ;;  %s4210_s6 = inlined_call_operand.vmem [shape: f32[1,128], index: 6, kind: input, shape index: {}]   ;;  %s4211_s7 = inlined_call_operand.hbm [shape: f32[2,1,128], index: 7, kind: output, shape index: {}]  }
   0x1   :  { %4220 = sst [smem:[#allocation16_spill]] %s4205_s1 }
   0x2   :  { %12 = vsyncpa [#allocation3], 0 }
   0x3   :  { %14 = vsyncpa [#allocation3 + $0x1], 0 }
   0x4   :  { %15 = vsyncpa [#allocation6], 0 }
   0x5   :  { %16 = vsyncpa [#allocation9], 0 }
   0x6   :  { %17 = vsyncpa [#allocation4], 0 }
   0x7   :  { %19 = vsyncpa [#allocation4 + $0x1], 0  ;;  %s3825_s24 = smov 0   ;;  %s3827_s25 = smov 0  }
   0x8   :  { %s3829_s26 = smov 0   ;;  %s3831_s27 = smov 0  }
   0x9 LB: > { %s3846_s28 = sadd.s32 4294967295, %s3773_s27   ;;  %s2800_s29 = sadd.s32 4294967294, %s3773_s27   ;;  %s3773_s27 = sphi %s3831_s27, %s4245_s27   ;;  %s3769_s26 = sphi %s3829_s26, %s4244_s26   ;;  %s3765_s25 = sphi %s3827_s25, %s4243_s25   ;;  %s3761_s24 = sphi %s3825_s24, %s4242_s24  }
   0xa   : > { %p45_p0 = scmp.ne.s32.totalorder %s3765_s25, %s3761_s24  ;;  %p4212_p1 = scmp.eq.s32.totalorder %s3846_s28, 0 }
   0xb   : > { %p201_p3 = scmp.eq.s32.totalorder %s2800_s29, 1  ;;  %p2801_p5 = scmp.ge.s32.totalorder %s3773_s27, 1 }
   0xc   : > { %p3855_p4 = por %p4212_p1, %p45_p0  ;;  %p208_p7 = scmp.lt.s32.totalorder %s3773_s27, 3 }
   0xd   : > { %p3860_p6 = por %p201_p3, %p45_p0  ;;  %s3775_s10 = smov [#allocation5]  }
   0xe   : > { %s4221_s30 = scalar_select %p3855_p4, 1, 0 }
   0xf   : > { %s4222_s8 = scalar_select %p3860_p6, 1, 0 }
  0x10   : > { %p3865_p8 = pnand %p2801_p5, %p208_p7  ;;  %s220_s11 = sshll.u32 %s3775_s10, 4  ;;  %s3869_s11 = int_to_ptr.vmem [resolvable:$true] %s220_s11 }
  0x11   : > { %4223 = sst [smem:[#allocation15_spill]] %s4222_s8  ;;  %s3776_s13 = smov [#allocation7]  }
  0x12   : > { %s4224_s9 = scalar_select %p3865_p8, 1, 0 }
  0x13   : > { %p3255_p9 = pneg %p3865_p8  ;;  %s236_s14 = sshll.u32 %s3776_s13, 4  ;;  %s3880_s14 = int_to_ptr.vmem [resolvable:$true] %s236_s14 }
  0x14   : > { %s4226_s1 = sld [smem:[#allocation16_spill]] }
  0x15   : > { %p3876_p11 = pnand %p3255_p9, %p4212_p1 }
  0x17   : > { %p3890_p13 = pneg %p3876_p11 }
  0x1a   : > { %s3585_s17 = scalar_lea.hbm %s4226_s1, 1024 }
  0x1b   : > { %p3586_p12 = scmp.ne.s32.totalorder %s4226_s1, %s3585_s17  ;;  %p3592_p5 = scmp.lt.u32.totalorder %s3585_s17, %s4226_s1 }
  0x1d   : > { %p3588_p0 = pnand %p3890_p13, %p3586_p12 }
  0x1f   : > { %p3589_p3 = pneg %p3588_p0 }
  0x21   : > { %p3594_p7 = pnand %p3592_p5, %p3589_p3 }
  0x23   : > { %3597 = shalt.err (!%p3594_p7)
}
  0x24   : > { %s3598_s23 = scalar_lea.vmem %s3869_s11, 1024  ;;  %p3606_p2 = scmp.lt.s32.totalorder %s3869_s11, %s3869_s11 }
  0x25   : > { %p3599_p9 = scmp.ne.s32.totalorder %s3869_s11, %s3598_s23  ;;  %p3607_p6 = scmp.lt.s32.totalorder %s3598_s23, %s3598_s23 }
  0x27   : > { %p3601_p10 = pnand %p3599_p9, %p3890_p13  ;;  %p3608_p12 = por %p3607_p6, %p3606_p2 }
  0x29   : > { %p3602_p1 = pneg %p3601_p10 }
  0x2b   : > { %p3609_p0 = pnand %p3608_p12, %p3602_p1 }
  0x2d   : > { %3612 = shalt.err (!%p3609_p0)
}
  0x2e   : > { %s4213_s29 = smov 64   ;;  %s4215_s10 = smov 4  }
  0x2f   : > { %3258 = dma.hbm_to_vmem [thread:$0]  (!%p3876_p11), %s4226_s1, 1024, %s3869_s11, [#allocation6], %s4213_s29, %s4213_s29, %s4215_s10  }
  0x30   : > { %s3613_s18 = scalar_lea.hbm %s4207_s3, 12288 }
  0x31   : > { %p3614_p1 = scmp.ne.s32.totalorder %s4207_s3, %s3613_s18  ;;  %p3620_p10 = scmp.lt.u32.totalorder %s3613_s18, %s4207_s3 }
  0x33   : > { %p3616_p2 = pnand %p3614_p1, %p3890_p13 }
  0x35   : > { %p3617_p6 = pneg %p3616_p2 }
  0x37   : > { %p3622_p3 = pnand %p3620_p10, %p3617_p6 }
  0x39   : > { %3625 = shalt.err (!%p3622_p3)
}
  0x3a   : > { %s3626_s11 = scalar_lea.vmem %s3880_s14, 12288  ;;  %p3634_p12 = scmp.lt.s32.totalorder %s3880_s14, %s3880_s14 }
  0x3b   : > { %p3627_p5 = scmp.ne.s32.totalorder %s3880_s14, %s3626_s11  ;;  %p3635_p0 = scmp.lt.s32.totalorder %s3626_s11, %s3626_s11 }
  0x3d   : > { %p3629_p7 = pnand %p3627_p5, %p3890_p13  ;;  %p3636_p1 = por %p3635_p0, %p3634_p12 }
  0x3f   : > { %p3630_p9 = pneg %p3629_p7 }
  0x41   : > { %p3637_p2 = pnand %p3636_p1, %p3630_p9 }
  0x43   : > { %3640 = shalt.err (!%p3637_p2)
}
  0x44   : > { %s3779_s13 = smov 768   ;;  %s3780_s15 = smov 48  }
  0x45   : > { %3261 = dma.hbm_to_vmem [thread:$0]  (!%p3876_p11), %s4207_s3, 12288, %s3880_s14, [#allocation6], %s3779_s13, %s3779_s13, %s3780_s15  }
  0x46   : > { %s3781_s18 = smov [#allocation8]   ;;  %s3938_s21 = sadd.s32 1, %s3773_s27  }
  0x47   : > { %s252_s19 = sshll.u32 %s3781_s18, 4  ;;  %s3641_s11 = scalar_lea.hbm %s4209_s5, 12288  ;;  %s253_s19 = int_to_ptr.vmem [resolvable:$true] %s252_s19 }
  0x48   : > { %p3642_p6 = scmp.ne.s32.totalorder %s4209_s5, %s3641_s11  ;;  %p3648_p5 = scmp.lt.u32.totalorder %s3641_s11, %s4209_s5 }
  0x4a   : > { %p3644_p10 = pnand %p3642_p6, %p3890_p13 }
  0x4c   : > { %p3645_p3 = pneg %p3644_p10 }
  0x4e   : > { %p3650_p7 = pnand %p3648_p5, %p3645_p3 }
  0x50   : > { %3653 = shalt.err (!%p3650_p7)
}
  0x51   : > { %s3654_s14 = scalar_lea.vmem %s253_s19, 12288  ;;  %p3662_p1 = scmp.lt.s32.totalorder %s253_s19, %s253_s19 }
  0x52   : > { %p3655_p9 = scmp.ne.s32.totalorder %s253_s19, %s3654_s14  ;;  %p3663_p2 = scmp.lt.s32.totalorder %s3654_s14, %s3654_s14 }
  0x54   : > { %p3657_p12 = pnand %p3655_p9, %p3890_p13  ;;  %p3664_p4 = por %p3663_p2, %p3662_p1 }
  0x56   : > { %p3658_p0 = pneg %p3657_p12 }
  0x58   : > { %p3665_p8 = pnand %p3664_p4, %p3658_p0 }
  0x5a   : > { %3668 = shalt.err (!%p3665_p8)
}
  0x5b   : > { %s4228_s29 = smov 4   ;;  %s4229_s10 = smov 64  }
  0x5c   : > { %3264 = dma.hbm_to_vmem [thread:$0]  (!%p3876_p11), %s4209_s5, 12288, %s253_s19, [#allocation9], %s4229_s10, %s4229_s10, %s4228_s29  }
  0x5d   : > { %s29_s20 = ssub.s32 %s3773_s27, %s3938_s21  ;;  %s32_s12 = sadd.s32 1, %s3769_s26 }
  0x5e   : > { %p30_p4 = scmp.eq.s32.totalorder %s29_s20, 0  ;;  %p39_p8 = scmp.ne.s32.totalorder %s3769_s26, %s3765_s25 }
  0x5f   : > { %p40_p13 = scmp.eq.s32.totalorder %s3773_s27, 0  ;;  %p3276_p6 = scmp.lt.s32.totalorder %s3773_s27, 2 }
  0x60   : > { %s3969_s13 = scalar_select %p30_p4, %s3769_s26, %s32_s12  }
  0x61   : > { %p41_p10 = por %p40_p13, %p39_p8  ;;  %p4230_p3 = scmp.eq.s32.totalorder %s3846_s28, 1 }
  0x62   : > { %s269_s16 = sand.u32 1, %s3769_s26   ;;  %s3034_s17 = sshll.u32 %s3773_s27, 11 }
  0x63   : > { %p3973_p5 = por %p4230_p3, %p39_p8  ;;  %s2806_s18 = sshll.u32 %s269_s16, 7 }
  0x64   : > { %s3982_s19 = scalar_lea.hbm %s4204_s0, %s3034_s17  ;;  %s273_s11 = scalar_lea.vmem [#allocation2], %s2806_s18 }
  0x65   : > { %s280_s14 = sshll.u32 %s273_s11, 4  ;;  %p3984_p11 = pnand %p3276_p6, %p41_p10  ;;  %s3988_s14 = int_to_ptr.vmem [resolvable:$true] %s280_s14 }
  0x66   : > { %s3990_s8 = scalar_lea.sflag [#allocation3], %s269_s16  ;;  %s3669_s20 = scalar_lea.hbm %s3982_s19, 2048 }
  0x67   : > { %p3670_p7 = scmp.ne.s32.totalorder %s3982_s19, %s3669_s20  ;;  %p3671_p9 = pneg %p3984_p11 }
  0x68   : > { %s3674_s18 = scalar_lea.hbm %s4204_s0, 4096  ;;  %p3675_p1 = scmp.lt.u32.totalorder %s3982_s19, %s4204_s0 }
  0x69   : > { %p3672_p12 = pnand %p3671_p9, %p3670_p7  ;;  %p3676_p2 = scmp.lt.u32.totalorder %s3674_s18, %s3669_s20 }
  0x6a   : > { %p3678_p8 = scmp.lt.u32.totalorder %s3669_s20, %s3982_s19 }
  0x6b   : > { %p3673_p0 = pneg %p3672_p12  ;;  %p3677_p4 = por %p3676_p2, %p3675_p1 }
  0x6d   : > { %p3679_p13 = por %p3678_p8, %p3677_p4 }
  0x6f   : > { %p3680_p6 = pnand %p3679_p13, %p3673_p0 }
  0x71   : > { %3683 = shalt.err (!%p3680_p6)
}
  0x72   : > { %s3684_s16 = scalar_lea.vmem %s3988_s14, 2048  ;;  %s3782_s11 = smov [#allocation2]  }
  0x73   : > { %p3685_p10 = scmp.ne.s32.totalorder %s3988_s14, %s3684_s16  ;;  %s3689_s12 = sshll.u32 %s3782_s11, 4  ;;  %s3690_s12 = int_to_ptr.vmem [resolvable:$false] %s3689_s12 }
  0x74   : > { %s3691_s17 = scalar_lea.vmem %s3690_s12, 4096  ;;  %p3692_p12 = scmp.lt.s32.totalorder %s3988_s14, %s3690_s12 }
  0x75   : > { %p3687_p3 = pnand %p3685_p10, %p3671_p9  ;;  %p3693_p1 = scmp.lt.s32.totalorder %s3691_s17, %s3684_s16 }
  0x77   : > { %p3688_p7 = pneg %p3687_p3  ;;  %p3694_p2 = por %p3693_p1, %p3692_p12 }
  0x79   : > { %p3695_p4 = pnand %p3694_p2, %p3688_p7 }
  0x7b   : > { %3698 = shalt.err (!%p3695_p4)
}
  0x7c   : > { %3268 = dma.hbm_to_vmem [thread:$0]  (!%p3984_p11), %s3982_s19, 2048, %s3988_s14, %s3990_s8, %s4229_s10, %s4229_s10, %s4228_s29  }
  0x7d   : > { %p4233_p9 = scmp.ne.s32.totalorder %s4224_s9, 0 }
  0x7e   : > { %s4024_s20 = sand.u32 (!%p4233_p9), 1, %s3765_s25   ;;  %p4234_p0 = scmp.ne.s32.totalorder (!%p4233_p9), %s4221_s30, 0 }
  0x7f   : > { %292 = sbr.rel (%p4233_p9) target bundleno = 1019 (0x3fb), region = 48  ;;  %s2810_s18 = sshll.u32 (!%p4233_p9), %s4024_s20, 7 }
  0x80   : > { %s295_s22 = scalar_lea.sflag (!%p4233_p9), [#allocation3], %s4024_s20  ;;  %s4028_s23 = scalar_lea.vmem (!%p4233_p9), [#allocation2], %s2810_s18 }
  0x86   : > { %3744 = dma.done.wait (%p4234_p0), %s295_s22, 2048  }
  0x87   : > { %3746 = vsyncadd (%p4234_p0), %s295_s22, 4294965248  ;;  %p4235_p11 = scmp.eq.s32.totalorder %s3846_s28, 0 }
  0x89   : > { %3748 = dma.done.wait (%p4235_p11), [#allocation6], 13312   ;;  %p4236_p8 = pmov %p4235_p11 }
  0x8b   : > { %3750 = vsyncadd (%p4236_p8), [#allocation6], 4294953984  ;;  %p4237_p13 = pmov %p4236_p8 }
  0x8c   : > { %p4238_p6 = pmov %p4236_p8 }
  0x8d   : > { %3752 = dma.done.wait (%p4237_p13), [#allocation9], 12288  }
  0x8e   : > { %3754 = vsyncadd (%p4238_p6), [#allocation9], 4294955008  ;;  %v3321_v0 = vld [vmem:[#allocation5] sm:$0xff]   ;;  %v3322_v1 = vld [vmem:[#allocation5 + $0x8] sm:$0xff]   ;;  %v3783_v58 = vmov 0   ;;  %s3031_s16 = sshll.u32 %s3846_s28, 4 }
  0x8f   : > { %3191 = vmatprep.subr.bf16.mxu0 %v3321_v0  ;;  %v3323_v2 = vld [vmem:[#allocation5 + $0x10] sm:$0xff]   ;;  %v3324_v3 = vld [vmem:[#allocation5 + $0x18] sm:$0xff]   ;;  %v3329_v4 = vld [vmem:[%s4028_s23] sm:$0xff]   ;;  %1444 = vmatprep.mubr.bf16.mxu1 %v3783_v58  ;;  %s339_s11 = scalar_lea.vmem [#allocation10], %s4024_s20  ;;  %s4160_s22 = scalar_lea.hbm %s4211_s7, %s3031_s16 }
  0x90   : > { %3192 = vmatpush3.bf16.msra.mxu0 %v3321_v0  ;;  %3207 = vmatprep.mubr.bf16.mxu0 %v3329_v4  ;;  %v3325_v5 = vld [vmem:[#allocation5 + $0x20] sm:$0xff]   ;;  %v3326_v6 = vld [vmem:[#allocation5 + $0x28] sm:$0xff]   ;;  %v3327_v7 = vld [vmem:[#allocation5 + $0x30] sm:$0xff]   ;;  %s2705_s12 = sshll.u32 %s339_s11, 4  ;;  %s3784_s28 = smov [#allocation10]   ;;  %s4162_s12 = int_to_ptr.vmem [resolvable:$true] %s2705_s12 }
  0x91   : > { %3193 = vmatprep.subr.bf16.mxu0 %v3322_v1  ;;  %v3328_v8 = vld [vmem:[#allocation5 + $0x38] sm:$0xff]   ;;  %v3330_v9 = vld [vmem:[%s4028_s23 + $0x8] sm:$0xff]   ;;  %v3331_v10 = vld [vmem:[%s4028_s23 + $0x10] sm:$0xff]   ;;  %s3699_s30 = scalar_lea.vmem %s4162_s12, 16  ;;  %s3703_s9 = sshll.u32 %s3784_s28, 4  ;;  %s3704_s9 = int_to_ptr.vmem [resolvable:$false] %s3703_s9 }
  0x92   : > { %v3332_v11 = vld [vmem:[%s4028_s23 + $0x18] sm:$0xff]   ;;  %v3333_v12 = vld [vmem:[%s4028_s23 + $0x20] sm:$0xff]   ;;  %v3334_v13 = vld [vmem:[%s4028_s23 + $0x28] sm:$0xff]   ;;  %p3700_p10 = scmp.ne.s32.totalorder %s4162_s12, %s3699_s30  ;;  %s3705_s29 = scalar_lea.vmem %s3704_s9, 32 }
  0x93   : > { %v3335_v14 = vld [vmem:[%s4028_s23 + $0x30] sm:$0xff]   ;;  %v3336_v15 = vld [vmem:[%s4028_s23 + $0x38] sm:$0xff]   ;;  %v3337_v16 = vld [vmem:[%s4028_s23 + $0x40] sm:$0xff]   ;;  %p3706_p12 = scmp.lt.s32.totalorder %s4162_s12, %s3704_s9  ;;  %p3707_p1 = scmp.lt.s32.totalorder %s3705_s29, %s3699_s30 }
  0x94   : > { %3194 = vmatpush3.bf16.msra.mxu0 %v3322_v1  ;;  %v3338_v17 = vld [vmem:[%s4028_s23 + $0x48] sm:$0xff]   ;;  %v3339_v18 = vld [vmem:[%s4028_s23 + $0x50] sm:$0xff]   ;;  %v3340_v19 = vld [vmem:[%s4028_s23 + $0x58] sm:$0xff]   ;;  %p3701_p3 = pnand %p3700_p10, %p3973_p5 }
  0x95   : > { %3195 = vmatprep.subr.bf16.mxu0 %v3323_v2  ;;  %v3341_v20 = vld [vmem:[%s4028_s23 + $0x60] sm:$0xff]   ;;  %v3342_v21 = vld [vmem:[%s4028_s23 + $0x68] sm:$0xff]   ;;  %v3343_v22 = vld [vmem:[%s4028_s23 + $0x70] sm:$0xff]   ;;  %p3708_p2 = por %p3707_p1, %p3706_p12 }
  0x96   : > { %v3344_v23 = vld [vmem:[%s4028_s23 + $0x78] sm:$0xff]   ;;  %v3345_v24 = vld [vmem:[#allocation7 + $0x4] ss:$48 sps:$4 sm:$0xff]   ;;  %v3347_v26 = vld [vmem:[#allocation7 + $0x10] ss:$48 sps:$4 sm:$0xff]   ;;  %s2693_s23 = scalar_lea.sflag [#allocation4], %s4024_s20  ;;  %p3702_p7 = pneg %p3701_p3 }
  0x97   : > { %v3349_v25 = vld [vmem:[#allocation7 + $0x14] ss:$48 sps:$4 sm:$0xff]   ;;  %v3350_v27 = vld [vmem:[#allocation7] ss:$48 sps:$4 sm:$0xff]   ;;  %1412 = vmatprep.subr.bf16.mxu1 %v3345_v24  ;;  %v3395_v56 = vld [vmem:[#allocation7 + $0xc] ss:$48 sps:$4 sm:$0xff]  }
  0x98   : > { %3196 = vmatpush3.bf16.msra.mxu0 %v3323_v2  ;;  %1413 = vmatpush1.bf16.msra.mxu1 %v3350_v27  ;;  %v3351_v28 = vld [vmem:[#allocation7 + $0x64] ss:$48 sps:$4 sm:$0xff]   ;;  %v3353_v30 = vld [vmem:[#allocation7 + $0x70] ss:$48 sps:$4 sm:$0xff]   ;;  %p3709_p4 = pnand %p3708_p2, %p3702_p7 }
  0x99   : > { %3197 = vmatprep.subr.bf16.mxu0 %v3324_v3  ;;  %v3355_v29 = vld [vmem:[#allocation7 + $0x74] ss:$48 sps:$4 sm:$0xff]   ;;  %v3356_v31 = vld [vmem:[#allocation7 + $0x60] ss:$48 sps:$4 sm:$0xff]   ;;  %1414 = vmatprep.subr.bf16.mxu1 %v3351_v28 }
  0x9a   : > { %v3357_v32 = vld [vmem:[#allocation7 + $0xc4] ss:$48 sps:$4 sm:$0xff]   ;;  %v3359_v34 = vld [vmem:[#allocation7 + $0xd0] ss:$48 sps:$4 sm:$0xff]  }
  0x9b   : > { %v3361_v33 = vld [vmem:[#allocation7 + $0xd4] ss:$48 sps:$4 sm:$0xff]   ;;  %v3362_v35 = vld [vmem:[#allocation7 + $0xc0] ss:$48 sps:$4 sm:$0xff]  }
  0x9c   : > { %3198 = vmatpush3.bf16.msra.mxu0 %v3324_v3  ;;  %1415 = vmatpush1.bf16.msra.mxu1 %v3356_v31  ;;  %v3363_v36 = vld [vmem:[#allocation7 + $0x124] ss:$48 sps:$4 sm:$0xff]   ;;  %v3365_v38 = vld [vmem:[#allocation7 + $0x130] ss:$48 sps:$4 sm:$0xff]  }
  0x9d   : > { %3199 = vmatprep.subr.bf16.mxu0 %v3325_v5  ;;  %1416 = vmatprep.subr.bf16.mxu1 %v3357_v32  ;;  %v3367_v37 = vld [vmem:[#allocation7 + $0x134] ss:$48 sps:$4 sm:$0xff]   ;;  %v3368_v39 = vld [vmem:[#allocation7 + $0x120] ss:$48 sps:$4 sm:$0xff]  }
  0x9e   : > { %v3369_v40 = vld [vmem:[#allocation7 + $0x184] ss:$48 sps:$4 sm:$0xff]   ;;  %v3371_v42 = vld [vmem:[#allocation7 + $0x190] ss:$48 sps:$4 sm:$0xff]  }
  0x9f   : > { %v3373_v41 = vld [vmem:[#allocation7 + $0x194] ss:$48 sps:$4 sm:$0xff]   ;;  %v3374_v43 = vld [vmem:[#allocation7 + $0x180] ss:$48 sps:$4 sm:$0xff]  }
  0xa0   : > { %3200 = vmatpush3.bf16.msra.mxu0 %v3325_v5  ;;  %1417 = vmatpush1.bf16.msra.mxu1 %v3362_v35  ;;  %v3375_v44 = vld [vmem:[#allocation7 + $0x1e4] ss:$48 sps:$4 sm:$0xff]   ;;  %v3377_v46 = vld [vmem:[#allocation7 + $0x1f0] ss:$48 sps:$4 sm:$0xff]  }
  0xa1   : > { %3201 = vmatprep.subr.bf16.mxu0 %v3326_v6  ;;  %1418 = vmatprep.subr.bf16.mxu1 %v3363_v36  ;;  %v3379_v45 = vld [vmem:[#allocation7 + $0x1f4] ss:$48 sps:$4 sm:$0xff]   ;;  %v3380_v47 = vld [vmem:[#allocation7 + $0x1e0] ss:$48 sps:$4 sm:$0xff]  }
  0xa2   : > { %v3381_v48 = vld [vmem:[#allocation7 + $0x244] ss:$48 sps:$4 sm:$0xff]   ;;  %v3383_v50 = vld [vmem:[#allocation7 + $0x250] ss:$48 sps:$4 sm:$0xff]  }
  0xa3   : > { %v3385_v49 = vld [vmem:[#allocation7 + $0x254] ss:$48 sps:$4 sm:$0xff]   ;;  %v3386_v51 = vld [vmem:[#allocation7 + $0x240] ss:$48 sps:$4 sm:$0xff]  }
  0xa4   : > { %3202 = vmatpush3.bf16.msra.mxu0 %v3326_v6  ;;  %1419 = vmatpush1.bf16.msra.mxu1 %v3368_v39  ;;  %v3387_v52 = vld [vmem:[#allocation7 + $0x2a4] ss:$48 sps:$4 sm:$0xff]   ;;  %v3389_v54 = vld [vmem:[#allocation7 + $0x2b0] ss:$48 sps:$4 sm:$0xff]  }
  0xa5   : > { %3203 = vmatprep.subr.bf16.mxu0 %v3327_v7  ;;  %1420 = vmatprep.subr.bf16.mxu1 %v3369_v40  ;;  %v3391_v53 = vld [vmem:[#allocation7 + $0x2b4] ss:$48 sps:$4 sm:$0xff]   ;;  %v3392_v55 = vld [vmem:[#allocation7 + $0x2a0] ss:$48 sps:$4 sm:$0xff]  }
  0xa6   : > { %v3398_v57 = vld [vmem:[#allocation7 + $0x24] ss:$48 sps:$4 sm:$0xff]   ;;  %v4063_v59 = vld [vmem:[%s4206_s2] ss:$0 sm:$0xff] }
  0xa8   : > { %3204 = vmatpush3.bf16.msra.mxu0 %v3327_v7  ;;  %1421 = vmatpush1.bf16.msra.mxu1 %v3374_v43 }
  0xa9   : > { %3205 = vmatprep.subr.bf16.mxu0 %v3328_v8  ;;  %1422 = vmatprep.subr.bf16.mxu1 %v3375_v44 }
  0xac   : > { %3206 = vmatpush3.bf16.msra.mxu0 %v3328_v8  ;;  %1423 = vmatpush1.bf16.msra.mxu1 %v3380_v47 }
  0xad   : > { %1494 = vmatprep.subr.bf16.mxu0 %v3349_v25  ;;  %1424 = vmatprep.subr.bf16.mxu1 %v3381_v48 }
  0xaf   : > { %3208 = vmatmul.mubr.bf16.vlgmr.msra.gmra.mrb[0].mxu0 %v3330_v9 }
  0xb0   : > { %3211 = vmatprep.mubr.bf16.mxu0 %v3331_v10  ;;  %1495 = vmatpush1.bf16.msra.mxu0 %v3347_v26 }
  0xb1   : > { %1496 = vmatprep.subr.bf16.mxu0 %v3355_v29  ;;  %1425 = vmatpush1.bf16.msra.mxu1 %v3386_v51 }
  0xb2   : > { %1426 = vmatprep.subr.bf16.mxu1 %v3387_v52 }
  0xb4   : > { %1497 = vmatpush1.bf16.msra.mxu0 %v3353_v30 }
  0xb5   : > { %1498 = vmatprep.subr.bf16.mxu0 %v3361_v33  ;;  %1427 = vmatpush1.bf16.msra.mxu1 %v3392_v55 }
  0xb6   : > { %1453 = vmatprep.subr.bf16.mxu1 %v3395_v56 }
  0xb7   : > { %3212 = vmatmul.mubr.bf16.gmra.mrb[4].mxu0 %v3332_v11 }
  0xb8   : > { %3215 = vmatprep.mubr.bf16.mxu0 %v3333_v12  ;;  %1499 = vmatpush1.bf16.msra.mxu0 %v3359_v34 }
  0xb9   : > { %1500 = vmatprep.subr.bf16.mxu0 %v3367_v37 }
  0xbc   : > { %1501 = vmatpush1.bf16.msra.mxu0 %v3365_v38 }
  0xbd   : > { %1502 = vmatprep.subr.bf16.mxu0 %v3373_v41 }
  0xbf   : > { %3216 = vmatmul.mubr.bf16.gmra.mrb[8].mxu0 %v3334_v13 }
  0xc0   : > { %3219 = vmatprep.mubr.bf16.mxu0 %v3335_v14  ;;  %1503 = vmatpush1.bf16.msra.mxu0 %v3371_v42 }
  0xc1   : > { %1504 = vmatprep.subr.bf16.mxu0 %v3379_v45 }
  0xc4   : > { %1505 = vmatpush1.bf16.msra.mxu0 %v3377_v46 }
  0xc5   : > { %1506 = vmatprep.subr.bf16.mxu0 %v3385_v49 }
  0xc7   : > { %3220 = vmatmul.mubr.bf16.gmra.mrb[12].mxu0 %v3336_v15 }
  0xc8   : > { %3223 = vmatprep.mubr.bf16.mxu0 %v3337_v16  ;;  %1507 = vmatpush1.bf16.msra.mxu0 %v3383_v50 }
  0xc9   : > { %1508 = vmatprep.subr.bf16.mxu0 %v3391_v53 }
  0xcc   : > { %1509 = vmatpush1.bf16.msra.mxu0 %v3389_v54 }
  0xcd   : > { %1576 = vmatprep.subr.bf16.mxu0 %v3398_v57 }
  0xcf   : > { %3224 = vmatmul.mubr.bf16.gmra.mrb[16].mxu0 %v3338_v17 }
  0xd0   : > { %3227 = vmatprep.mubr.bf16.mxu0 %v3339_v18 }
  0xd7   : > { %3228 = vmatmul.mubr.bf16.gmra.mrb[20].mxu0 %v3340_v19 }
  0xd8   : > { %3231 = vmatprep.mubr.bf16.mxu0 %v3341_v20 }
  0xdf   : > { %3232 = vmatmul.mubr.bf16.gmra.mrb[24].mxu0 %v3342_v21 }
  0xe0   : > { %3235 = vmatprep.mubr.bf16.mxu0 %v3343_v22 }
  0xe7   : > { %3236 = vmatmul.mubr.bf16.gmra.mrb[28].mxu0 %v3344_v23 }
  0xe8   : > { %1526 = vmatprep.mubr.bf16.mxu0 %v3783_v58 }
 0x182   : > { %v3209_v60 = vpop.f32.mrb[0].mxu0 }
 0x183   : > { %v574_v61 = vpop.f32.mrb[1].mxu0  ;;  %v583_v1 = vadd.f32 %v3209_v60, %v4063_v59 }
 0x184   : > { %v575_v62 = vadd.f32 %v4063_v59, %v574_v61  ;;  %v3210_v63 = vpop.f32.mrb[2].mxu0 }
 0x185   : > { %v577_v0 = vpop.f32.mrb[3].mxu0  ;;  %v586_v4 = vadd.f32 %v3210_v63, %v4063_v59  ;;  %v703_v6 = vmax.f32 %v583_v1, 0.0 }
 0x186   : > { %v578_v2 = vadd.f32 %v4063_v59, %v577_v0  ;;  %v701_v3 = vmax.f32 %v575_v62, 0.0 }
 0x187   : > { %v704_v10 = vmax.f32 %v586_v4, 0.0 }
 0x188   : > { %v702_v5 = vmax.f32 %v578_v2, 0.0 }
 0x18a   : > { %v733_v7 = vadd.f32 %v702_v5, %v701_v3  ;;  %v3213_v8 = vpop.f32.mrb[4].mxu0 }
 0x18b   : > { %v590_v9 = vpop.f32.mrb[5].mxu0  ;;  %v599_v15 = vadd.f32 %v3213_v8, %v4063_v59 }
 0x18c   : > { %v734_v11 = vadd.f32 %v733_v7, %v703_v6  ;;  %v591_v12 = vadd.f32 %v4063_v59, %v590_v9  ;;  %v3214_v13 = vpop.f32.mrb[6].mxu0 }
 0x18d   : > { %v593_v14 = vpop.f32.mrb[7].mxu0  ;;  %v602_v20 = vadd.f32 %v3214_v13, %v4063_v59  ;;  %v707_v22 = vmax.f32 %v599_v15, 0.0 }
 0x18e   : > { %v705_v16 = vmax.f32 %v591_v12, 0.0  ;;  %v735_v17 = vadd.f32 %v734_v11, %v704_v10  ;;  %v594_v18 = vadd.f32 %v4063_v59, %v593_v14 }
 0x18f   : > { %v708_v26 = vmax.f32 %v602_v20, 0.0 }
 0x190   : > { %v736_v19 = vadd.f32 %v735_v17, %v705_v16  ;;  %v706_v21 = vmax.f32 %v594_v18, 0.0 }
 0x192   : > { %v737_v23 = vadd.f32 %v736_v19, %v706_v21  ;;  %v3217_v24 = vpop.f32.mrb[8].mxu0 }
 0x193   : > { %v606_v25 = vpop.f32.mrb[9].mxu0  ;;  %v615_v31 = vadd.f32 %v3217_v24, %v4063_v59 }
 0x194   : > { %v738_v27 = vadd.f32 %v737_v23, %v707_v22  ;;  %v607_v28 = vadd.f32 %v4063_v59, %v606_v25  ;;  %v3218_v29 = vpop.f32.mrb[10].mxu0 }
 0x195   : > { %v609_v30 = vpop.f32.mrb[11].mxu0  ;;  %v618_v36 = vadd.f32 %v3218_v29, %v4063_v59  ;;  %v711_v38 = vmax.f32 %v615_v31, 0.0 }
 0x196   : > { %v709_v32 = vmax.f32 %v607_v28, 0.0  ;;  %v739_v33 = vadd.f32 %v738_v27, %v708_v26  ;;  %v610_v34 = vadd.f32 %v4063_v59, %v609_v30 }
 0x197   : > { %v712_v42 = vmax.f32 %v618_v36, 0.0 }
 0x198   : > { %v740_v35 = vadd.f32 %v739_v33, %v709_v32  ;;  %v710_v37 = vmax.f32 %v610_v34, 0.0 }
 0x19a   : > { %v741_v39 = vadd.f32 %v740_v35, %v710_v37  ;;  %v3221_v40 = vpop.f32.mrb[12].mxu0 }
 0x19b   : > { %v622_v41 = vpop.f32.mrb[13].mxu0  ;;  %v631_v47 = vadd.f32 %v3221_v40, %v4063_v59 }
 0x19c   : > { %v742_v43 = vadd.f32 %v741_v39, %v711_v38  ;;  %v623_v44 = vadd.f32 %v4063_v59, %v622_v41  ;;  %v3222_v45 = vpop.f32.mrb[14].mxu0 }
 0x19d   : > { %v625_v46 = vpop.f32.mrb[15].mxu0  ;;  %v634_v52 = vadd.f32 %v3222_v45, %v4063_v59  ;;  %v715_v54 = vmax.f32 %v631_v47, 0.0 }
 0x19e   : > { %v713_v48 = vmax.f32 %v623_v44, 0.0  ;;  %v743_v49 = vadd.f32 %v742_v43, %v712_v42  ;;  %v626_v50 = vadd.f32 %v4063_v59, %v625_v46 }
 0x19f   : > { %v716_v60 = vmax.f32 %v634_v52, 0.0 }
 0x1a0   : > { %v744_v51 = vadd.f32 %v743_v49, %v713_v48  ;;  %v714_v53 = vmax.f32 %v626_v50, 0.0 }
 0x1a2   : > { %v745_v55 = vadd.f32 %v744_v51, %v714_v53  ;;  %v3225_v56 = vpop.f32.mrb[16].mxu0 }
 0x1a3   : > { %v638_v57 = vpop.f32.mrb[17].mxu0  ;;  %v647_v1 = vadd.f32 %v3225_v56, %v4063_v59 }
 0x1a4   : > { %v746_v61 = vadd.f32 %v745_v55, %v715_v54  ;;  %v639_v62 = vadd.f32 %v4063_v59, %v638_v57  ;;  %v3226_v63 = vpop.f32.mrb[18].mxu0 }
 0x1a5   : > { %v641_v0 = vpop.f32.mrb[19].mxu0  ;;  %v650_v6 = vadd.f32 %v3226_v63, %v4063_v59  ;;  %v719_v8 = vmax.f32 %v647_v1, 0.0 }
 0x1a6   : > { %v717_v2 = vmax.f32 %v639_v62, 0.0  ;;  %v747_v3 = vadd.f32 %v746_v61, %v716_v60  ;;  %v642_v4 = vadd.f32 %v4063_v59, %v641_v0 }
 0x1a7   : > { %v720_v12 = vmax.f32 %v650_v6, 0.0  ;;  %v3393_v6 = vld [vmem:[#allocation7 + $0x8] ss:$48 sps:$4 sm:$0xff]  }
 0x1a8   : > { %v748_v5 = vadd.f32 %v747_v3, %v717_v2  ;;  %v718_v7 = vmax.f32 %v642_v4, 0.0 }
 0x1aa   : > { %v749_v9 = vadd.f32 %v748_v5, %v718_v7  ;;  %v3229_v10 = vpop.f32.mrb[20].mxu0  ;;  %v3396_v7 = vld [vmem:[#allocation7 + $0x20] ss:$48 sps:$4 sm:$0xff]  }
 0x1ab   : > { %v654_v11 = vpop.f32.mrb[21].mxu0  ;;  %v663_v17 = vadd.f32 %v3229_v10, %v4063_v59  ;;  %v3404_v10 = vld [vmem:[#allocation7 + $0x84] ss:$48 sps:$4 sm:$0xff]  }
 0x1ac   : > { %v750_v13 = vadd.f32 %v749_v9, %v719_v8  ;;  %v655_v14 = vadd.f32 %v4063_v59, %v654_v11  ;;  %v3230_v15 = vpop.f32.mrb[22].mxu0  ;;  %v3401_v9 = vld [vmem:[#allocation7 + $0x6c] ss:$48 sps:$4 sm:$0xff]   ;;  %v3402_v11 = vld [vmem:[#allocation7 + $0x80] ss:$48 sps:$4 sm:$0xff]  }
 0x1ad   : > { %v657_v16 = vpop.f32.mrb[23].mxu0  ;;  %v666_v22 = vadd.f32 %v3230_v15, %v4063_v59  ;;  %v723_v24 = vmax.f32 %v663_v17, 0.0  ;;  %v3408_v15 = vld [vmem:[#allocation7 + $0xe0] ss:$48 sps:$4 sm:$0xff]   ;;  %v3416_v17 = vld [vmem:[#allocation7 + $0x144] ss:$48 sps:$4 sm:$0xff]  }
 0x1ae   : > { %v721_v18 = vmax.f32 %v655_v14, 0.0  ;;  %v751_v19 = vadd.f32 %v750_v13, %v720_v12  ;;  %v658_v20 = vadd.f32 %v4063_v59, %v657_v16  ;;  %v3407_v12 = vld [vmem:[#allocation7 + $0xcc] ss:$48 sps:$4 sm:$0xff]   ;;  %v3410_v13 = vld [vmem:[#allocation7 + $0xe4] ss:$48 sps:$4 sm:$0xff]  }
 0x1af   : > { %v724_v28 = vmax.f32 %v666_v22, 0.0  ;;  %v3405_v14 = vld [vmem:[#allocation7 + $0xc8] ss:$48 sps:$4 sm:$0xff]   ;;  %v3413_v16 = vld [vmem:[#allocation7 + $0x12c] ss:$48 sps:$4 sm:$0xff]  }
 0x1b0   : > { %v752_v21 = vadd.f32 %v751_v19, %v721_v18  ;;  %v722_v23 = vmax.f32 %v658_v20, 0.0  ;;  %v3411_v18 = vld [vmem:[#allocation7 + $0x128] ss:$48 sps:$4 sm:$0xff]   ;;  %v3414_v19 = vld [vmem:[#allocation7 + $0x140] ss:$48 sps:$4 sm:$0xff]  }
 0x1b1   : > { %v3419_v20 = vld [vmem:[#allocation7 + $0x18c] ss:$48 sps:$4 sm:$0xff]   ;;  %v3417_v22 = vld [vmem:[#allocation7 + $0x188] ss:$48 sps:$4 sm:$0xff]  }
 0x1b2   : > { %v753_v25 = vadd.f32 %v752_v21, %v722_v23  ;;  %v3233_v26 = vpop.f32.mrb[24].mxu0  ;;  %v3422_v21 = vld [vmem:[#allocation7 + $0x1a4] ss:$48 sps:$4 sm:$0xff]   ;;  %v3420_v23 = vld [vmem:[#allocation7 + $0x1a0] ss:$48 sps:$4 sm:$0xff]  }
 0x1b3   : > { %v670_v27 = vpop.f32.mrb[25].mxu0  ;;  %v679_v33 = vadd.f32 %v3233_v26, %v4063_v59  ;;  %v3423_v26 = vld [vmem:[#allocation7 + $0x1e8] ss:$48 sps:$4 sm:$0xff]  }
 0x1b4   : > { %v754_v29 = vadd.f32 %v753_v25, %v723_v24  ;;  %v671_v30 = vadd.f32 %v4063_v59, %v670_v27  ;;  %v3234_v31 = vpop.f32.mrb[26].mxu0  ;;  %v3425_v24 = vld [vmem:[#allocation7 + $0x1ec] ss:$48 sps:$4 sm:$0xff]   ;;  %v3428_v25 = vld [vmem:[#allocation7 + $0x204] ss:$48 sps:$4 sm:$0xff]  }
 0x1b5   : > { %v673_v32 = vpop.f32.mrb[27].mxu0  ;;  %v682_v38 = vadd.f32 %v3234_v31, %v4063_v59  ;;  %v727_v40 = vmax.f32 %v679_v33, 0.0  ;;  %v3426_v27 = vld [vmem:[#allocation7 + $0x200] ss:$48 sps:$4 sm:$0xff]   ;;  %v3440_v33 = vld [vmem:[#allocation7 + $0x2c4] ss:$48 sps:$4 sm:$0xff]  }
 0x1b6   : > { %v725_v34 = vmax.f32 %v671_v30, 0.0  ;;  %v755_v35 = vadd.f32 %v754_v29, %v724_v28  ;;  %v674_v36 = vadd.f32 %v4063_v59, %v673_v32  ;;  %v3431_v28 = vld [vmem:[#allocation7 + $0x24c] ss:$48 sps:$4 sm:$0xff]   ;;  %v3434_v29 = vld [vmem:[#allocation7 + $0x264] ss:$48 sps:$4 sm:$0xff]  }
 0x1b7   : > { %v728_v44 = vmax.f32 %v682_v38, 0.0  ;;  %v3429_v30 = vld [vmem:[#allocation7 + $0x248] ss:$48 sps:$4 sm:$0xff]   ;;  %v3432_v31 = vld [vmem:[#allocation7 + $0x260] ss:$48 sps:$4 sm:$0xff]  }
 0x1b8   : > { %v756_v37 = vadd.f32 %v755_v35, %v725_v34  ;;  %v726_v39 = vmax.f32 %v674_v36, 0.0  ;;  %v3437_v32 = vld [vmem:[#allocation7 + $0x2ac] ss:$48 sps:$4 sm:$0xff]   ;;  %v3435_v34 = vld [vmem:[#allocation7 + $0x2a8] ss:$48 sps:$4 sm:$0xff]  }
 0x1b9   : > { %v3438_v35 = vld [vmem:[#allocation7 + $0x2c0] ss:$48 sps:$4 sm:$0xff]   ;;  %v3443_v36 = vld [vmem:[#allocation7 + $0x1c] ss:$48 sps:$4 sm:$0xff]   ;;  %v3441_v38 = vld [vmem:[#allocation7 + $0x18] ss:$48 sps:$4 sm:$0xff]  }
 0x1ba   : > { %v757_v41 = vadd.f32 %v756_v37, %v726_v39  ;;  %v3237_v42 = vpop.f32.mrb[28].mxu0  ;;  %v3489_v37 = vld [vmem:[#allocation8 + $0x40] sm:$0xff]   ;;  %v3446_v39 = vld [vmem:[#allocation7 + $0x7c] ss:$48 sps:$4 sm:$0xff]  }
 0x1bb   : > { %v686_v43 = vpop.f32.mrb[29].mxu0  ;;  %v695_v49 = vadd.f32 %v3237_v42, %v4063_v59  ;;  %v3444_v42 = vld [vmem:[#allocation7 + $0x78] ss:$48 sps:$4 sm:$0xff]  }
 0x1bc   : > { %v758_v45 = vadd.f32 %v757_v41, %v727_v40  ;;  %v687_v46 = vadd.f32 %v4063_v59, %v686_v43  ;;  %v3238_v47 = vpop.f32.mrb[30].mxu0  ;;  %v3490_v40 = vld [vmem:[#allocation8] sm:$0xff]   ;;  %v3491_v41 = vld [vmem:[#allocation8 + $0x48] sm:$0xff]  }
 0x1bd   : > { %v689_v48 = vpop.f32.mrb[31].mxu0  ;;  %v698_v54 = vadd.f32 %v3238_v47, %v4063_v59  ;;  %v731_v56 = vmax.f32 %v695_v49, 0.0  ;;  %v3449_v43 = vld [vmem:[#allocation7 + $0xdc] ss:$48 sps:$4 sm:$0xff]  }
 0x1be   : > { %v729_v50 = vmax.f32 %v687_v46, 0.0  ;;  %v759_v51 = vadd.f32 %v758_v45, %v728_v44  ;;  %v690_v52 = vadd.f32 %v4063_v59, %v689_v48  ;;  %v3399_v59 = vld [vmem:[#allocation7 + $0x68] ss:$48 sps:$4 sm:$0xff]   ;;  %v3493_v45 = vld [vmem:[#allocation8 + $0x50] sm:$0xff]   ;;  %v3452_v47 = vld [vmem:[#allocation7 + $0x13c] ss:$48 sps:$4 sm:$0xff]  }
 0x1bf   : > { %v732_v60 = vmax.f32 %v698_v54, 0.0  ;;  %v3492_v44 = vld [vmem:[#allocation8 + $0x8] sm:$0xff]   ;;  %v3494_v48 = vld [vmem:[#allocation8 + $0x10] sm:$0xff]   ;;  %v3495_v49 = vld [vmem:[#allocation8 + $0x58] sm:$0xff]  }
 0x1c0   : > { %v760_v53 = vadd.f32 %v759_v51, %v729_v50  ;;  %v730_v55 = vmax.f32 %v690_v52, 0.0  ;;  %v3447_v46 = vld [vmem:[#allocation7 + $0xd8] ss:$48 sps:$4 sm:$0xff]   ;;  %v3455_v51 = vld [vmem:[#allocation7 + $0x19c] ss:$48 sps:$4 sm:$0xff]  }
 0x1c1   : > { %v3450_v50 = vld [vmem:[#allocation7 + $0x138] ss:$48 sps:$4 sm:$0xff]  }
 0x1c2   : > { %v761_v57 = vadd.f32 %v760_v53, %v730_v55  ;;  %v3496_v52 = vld [vmem:[#allocation8 + $0x18] sm:$0xff]   ;;  %v3497_v53 = vld [vmem:[#allocation8 + $0x60] sm:$0xff]  }
 0x1c3   : > { %v3453_v54 = vld [vmem:[#allocation7 + $0x198] ss:$48 sps:$4 sm:$0xff]   ;;  %v3458_v55 = vld [vmem:[#allocation7 + $0x1fc] ss:$48 sps:$4 sm:$0xff]  }
 0x1c4   : > { %v762_v61 = vadd.f32 %v761_v57, %v731_v56  ;;  %v3498_v56 = vld [vmem:[#allocation8 + $0x20] sm:$0xff]   ;;  %v3499_v57 = vld [vmem:[#allocation8 + $0x68] sm:$0xff]  }
 0x1c6   : > { %v763_v62 = vadd.f32 %v762_v61, %v732_v60  ;;  %v3456_v60 = vld [vmem:[#allocation7 + $0x1f8] ss:$48 sps:$4 sm:$0xff]   ;;  %v3461_v61 = vld [vmem:[#allocation7 + $0x25c] ss:$48 sps:$4 sm:$0xff]  }
 0x1c8   : > { %v764_v63 = vrot.slane %v763_v62, 4 }
 0x1ca   : > { %v765_v0 = vadd.f32 %v764_v63, %v763_v62  ;;  %v3500_v62 = vld [vmem:[#allocation8 + $0x28] sm:$0xff]  }
 0x1cb   : > { %v3459_v63 = vld [vmem:[#allocation7 + $0x258] ss:$48 sps:$4 sm:$0xff]  }
 0x1cc   : > { %v766_v1 = vrot.slane %v765_v0, 2 }
 0x1ce   : > { %v767_v2 = vadd.f32 %v766_v1, %v765_v0  ;;  %v3464_v0 = vld [vmem:[#allocation7 + $0x2bc] ss:$48 sps:$4 sm:$0xff]   ;;  %v3462_v1 = vld [vmem:[#allocation7 + $0x2b8] ss:$48 sps:$4 sm:$0xff]  }
 0x1d0   : > { %v768_v3 = vrot.slane %v767_v2, 1 }
 0x1d2   : > { %v769_v4 = vadd.f32 %v768_v3, %v767_v2  ;;  %v3467_v2 = vld [vmem:[#allocation7 + $0x2c] ss:$48 sps:$4 sm:$0xff]   ;;  %v3465_v3 = vld [vmem:[#allocation7 + $0x28] ss:$48 sps:$4 sm:$0xff]  }
 0x1d4   : > { %v770_v5 = vmul.f32 0.00390625, %v769_v4  ;;  %v3470_v4 = vld [vmem:[#allocation7 + $0x8c] ss:$48 sps:$4 sm:$0xff]  }
 0x1d6   : > { %v4097_v8 = vpack.c.bf16 %v770_v5, %v770_v5  ;;  %v3468_v5 = vld [vmem:[#allocation7 + $0x88] ss:$48 sps:$4 sm:$0xff]  }
 0x1d8   : > { %1445 = vmatmul.mubr.bf16.vlgmr.msra.gmra.mrb[0].mxu1 %v4097_v8  ;;  %1527 = vmatmul.mubr.bf16.vlgmr.msra.gmra.mrb[32].mxu0 %v4097_v8 }
 0x1d9   : > { %1454 = vmatpush1.bf16.msra.mxu1 %v3393_v6  ;;  %1577 = vmatpush1.bf16.msra.mxu0 %v3396_v7  ;;  %v3473_v6 = vld [vmem:[#allocation7 + $0xec] ss:$48 sps:$4 sm:$0xff]   ;;  %v3471_v7 = vld [vmem:[#allocation7 + $0xe8] ss:$48 sps:$4 sm:$0xff]  }
 0x1da   : > { %1455 = vmatprep.subr.bf16.mxu1 %v3401_v9  ;;  %1578 = vmatprep.subr.bf16.mxu0 %v3404_v10  ;;  %v3476_v9 = vld [vmem:[#allocation7 + $0x14c] ss:$48 sps:$4 sm:$0xff]   ;;  %v3474_v10 = vld [vmem:[#allocation7 + $0x148] ss:$48 sps:$4 sm:$0xff]  }
 0x1db   : > { %1485 = vmatprep.mubr.bf16.mxu1 %v3783_v58  ;;  %1608 = vmatprep.mubr.bf16.mxu0 %v3783_v58 }
 0x1dd   : > { %1456 = vmatpush1.bf16.msra.mxu1 %v3399_v59  ;;  %1579 = vmatpush1.bf16.msra.mxu0 %v3402_v11  ;;  %v3479_v59 = vld [vmem:[#allocation7 + $0x1ac] ss:$48 sps:$4 sm:$0xff]   ;;  %v3477_v11 = vld [vmem:[#allocation7 + $0x1a8] ss:$48 sps:$4 sm:$0xff]  }
 0x1de   : > { %1457 = vmatprep.subr.bf16.mxu1 %v3407_v12  ;;  %1580 = vmatprep.subr.bf16.mxu0 %v3410_v13  ;;  %v3482_v12 = vld [vmem:[#allocation7 + $0x20c] ss:$48 sps:$4 sm:$0xff]   ;;  %v3480_v13 = vld [vmem:[#allocation7 + $0x208] ss:$48 sps:$4 sm:$0xff]  }
 0x1e1   : > { %1458 = vmatpush1.bf16.msra.mxu1 %v3405_v14  ;;  %1581 = vmatpush1.bf16.msra.mxu0 %v3408_v15  ;;  %v3485_v14 = vld [vmem:[#allocation7 + $0x26c] ss:$48 sps:$4 sm:$0xff]   ;;  %v3501_v15 = vld [vmem:[#allocation8 + $0x70] sm:$0xff]  }
 0x1e2   : > { %1459 = vmatprep.subr.bf16.mxu1 %v3413_v16  ;;  %1582 = vmatprep.subr.bf16.mxu0 %v3416_v17  ;;  %v3483_v16 = vld [vmem:[#allocation7 + $0x268] ss:$48 sps:$4 sm:$0xff]   ;;  %v3488_v17 = vld [vmem:[#allocation7 + $0x2cc] ss:$48 sps:$4 sm:$0xff]  }
 0x1e5   : > { %1460 = vmatpush1.bf16.msra.mxu1 %v3411_v18  ;;  %1583 = vmatpush1.bf16.msra.mxu0 %v3414_v19  ;;  %v3503_v18 = vld [vmem:[#allocation8 + $0x78] sm:$0xff]  }
 0x1e6   : > { %1461 = vmatprep.subr.bf16.mxu1 %v3419_v20  ;;  %1584 = vmatprep.subr.bf16.mxu0 %v3422_v21  ;;  %v3504_v19 = vld [vmem:[#allocation8 + $0x38] sm:$0xff]   ;;  %v3505_v21 = vld [vmem:[#allocation8 + $0xc0] sm:$0xff]  }
 0x1e7   : > { %v3486_v20 = vld [vmem:[#allocation7 + $0x2c8] ss:$48 sps:$4 sm:$0xff]  }
 0x1e9   : > { %1462 = vmatpush1.bf16.msra.mxu1 %v3417_v22  ;;  %1585 = vmatpush1.bf16.msra.mxu0 %v3420_v23  ;;  %v3506_v22 = vld [vmem:[#allocation8 + $0x140] sm:$0xff]  }
 0x1ea   : > { %1463 = vmatprep.subr.bf16.mxu1 %v3425_v24  ;;  %1586 = vmatprep.subr.bf16.mxu0 %v3428_v25  ;;  %v3507_v23 = vld [vmem:[#allocation8 + $0x80] sm:$0xff]   ;;  %v3509_v24 = vld [vmem:[#allocation8 + $0xc8] sm:$0xff]  }
 0x1eb   : > { %v3511_v25 = vld [vmem:[#allocation8 + $0x88] sm:$0xff]  }
 0x1ed   : > { %1464 = vmatpush1.bf16.msra.mxu1 %v3423_v26  ;;  %1587 = vmatpush1.bf16.msra.mxu0 %v3426_v27  ;;  %v3513_v26 = vld [vmem:[#allocation8 + $0xd0] sm:$0xff]  }
 0x1ee   : > { %1465 = vmatprep.subr.bf16.mxu1 %v3431_v28  ;;  %1588 = vmatprep.subr.bf16.mxu0 %v3434_v29  ;;  %v3515_v27 = vld [vmem:[#allocation8 + $0x90] sm:$0xff]   ;;  %v3517_v28 = vld [vmem:[#allocation8 + $0xd8] sm:$0xff]  }
 0x1ef   : > { %v3519_v29 = vld [vmem:[#allocation8 + $0x98] sm:$0xff]  }
 0x1f1   : > { %1466 = vmatpush1.bf16.msra.mxu1 %v3429_v30  ;;  %1589 = vmatpush1.bf16.msra.mxu0 %v3432_v31  ;;  %v3521_v30 = vld [vmem:[#allocation8 + $0xe0] sm:$0xff]  }
 0x1f2   : > { %1467 = vmatprep.subr.bf16.mxu1 %v3437_v32  ;;  %1590 = vmatprep.subr.bf16.mxu0 %v3440_v33  ;;  %v3523_v31 = vld [vmem:[#allocation8 + $0xa0] sm:$0xff]   ;;  %v3525_v32 = vld [vmem:[#allocation8 + $0xe8] sm:$0xff]  }
 0x1f3   : > { %v3527_v33 = vld [vmem:[#allocation8 + $0xa8] sm:$0xff]  }
 0x1f5   : > { %1468 = vmatpush1.bf16.msra.mxu1 %v3435_v34  ;;  %1591 = vmatpush1.bf16.msra.mxu0 %v3438_v35  ;;  %v3531_v34 = vld [vmem:[#allocation8 + $0xb0] sm:$0xff]   ;;  %v3533_v35 = vld [vmem:[#allocation8 + $0xf8] sm:$0xff]  }
 0x1f6   : > { %1535 = vmatprep.subr.bf16.mxu1 %v3443_v36  ;;  %3059 = vmatprep.subr.bf16.mxu0 %v3489_v37  ;;  %v3535_v36 = vld [vmem:[#allocation8 + $0xb8] sm:$0xff]   ;;  %v3537_v37 = vld [vmem:[#allocation8 + $0x1c0] sm:$0xff]  }
 0x1f8   : > { %1486 = vmatmul.mubr.bf16.vlgmr.msra.gmra.mrb[4].mxu1 %v4097_v8  ;;  %1609 = vmatmul.mubr.bf16.vlgmr.msra.gmra.mrb[36].mxu0 %v4097_v8 }
 0x1f9   : > { %1536 = vmatpush1.bf16.msra.mxu1 %v3441_v38  ;;  %1567 = vmatprep.mubr.bf16.mxu1 %v3783_v58  ;;  %v1352_v38 = vlaneseq }
 0x1fa   : > { %1537 = vmatprep.subr.bf16.mxu1 %v3446_v39  ;;  %3060 = vmatpush3.bf16.msra.mxu0 %v3490_v40 }
 0x1fb   : > { %3061 = vmatprep.subr.bf16.mxu0 %v3491_v41  ;;  %v4109_v39 = vshrl.u32 %v1352_v38, 7  ;;  %v4115_v41 = vld [vmem:[%s4208_s4] sm:$0xff] }
 0x1fd   : > { %1538 = vmatpush1.bf16.msra.mxu1 %v3444_v42  ;;  %v1354_v40 = vsub.s32 0, %v4109_v39  ;;  %v1358_v42 = vsub.s32 1, %v4109_v39 }
 0x1fe   : > { %1539 = vmatprep.subr.bf16.mxu1 %v3449_v43  ;;  %3062 = vmatpush3.bf16.msra.mxu0 %v3492_v44  ;;  %v1374_v43 = vsub.s32 5, %v4109_v39 }
 0x1ff   : > { %3063 = vmatprep.subr.bf16.mxu0 %v3493_v45  ;;  %v1355_v44 = vrot.slane %v4115_v41, %v1354_v40  ;;  %v1359_v45 = vrot.slane %v4115_v41, %v1358_v42 }
 0x201   : > { %1540 = vmatpush1.bf16.msra.mxu1 %v3447_v46  ;;  %v1375_v46 = vrot.slane %v4115_v41, %v1374_v43 }
 0x202   : > { %1541 = vmatprep.subr.bf16.mxu1 %v3452_v47  ;;  %3064 = vmatpush3.bf16.msra.mxu0 %v3494_v48 }
 0x203   : > { %3065 = vmatprep.subr.bf16.mxu0 %v3495_v49 }
 0x205   : > { %1542 = vmatpush1.bf16.msra.mxu1 %v3450_v50 }
 0x206   : > { %1543 = vmatprep.subr.bf16.mxu1 %v3455_v51  ;;  %3066 = vmatpush3.bf16.msra.mxu0 %v3496_v52 }
 0x207   : > { %3067 = vmatprep.subr.bf16.mxu0 %v3497_v53 }
 0x209   : > { %1544 = vmatpush1.bf16.msra.mxu1 %v3453_v54 }
 0x20a   : > { %1545 = vmatprep.subr.bf16.mxu1 %v3458_v55  ;;  %3068 = vmatpush3.bf16.msra.mxu0 %v3498_v56 }
 0x20b   : > { %3069 = vmatprep.subr.bf16.mxu0 %v3499_v57 }
 0x20d   : > { %1546 = vmatpush1.bf16.msra.mxu1 %v3456_v60 }
 0x20e   : > { %1547 = vmatprep.subr.bf16.mxu1 %v3461_v61  ;;  %3070 = vmatpush3.bf16.msra.mxu0 %v3500_v62 }
 0x20f   : > { %3071 = vmatprep.subr.bf16.mxu0 %v3501_v15  ;;  %v4127_v15 = vld [vmem:[%s4208_s4 + $0x8] sm:$0xf] }
 0x211   : > { %1548 = vmatpush1.bf16.msra.mxu1 %v3459_v63 }
 0x212   : > { %1549 = vmatprep.subr.bf16.mxu1 %v3464_v0  ;;  %v3508_v0 = vld [vmem:[#allocation8 + $0x100] sm:$0xff]  }
 0x215   : > { %1550 = vmatpush1.bf16.msra.mxu1 %v3462_v1 }
 0x216   : > { %1617 = vmatprep.subr.bf16.mxu1 %v3467_v2  ;;  %v3510_v2 = vld [vmem:[#allocation8 + $0x148] sm:$0xff]  }
 0x218   : > { %1568 = vmatmul.mubr.bf16.vlgmr.msra.gmra.mrb[8].mxu1 %v4097_v8 }
 0x219   : > { %1618 = vmatpush1.bf16.msra.mxu1 %v3465_v3  ;;  %1649 = vmatprep.mubr.bf16.mxu1 %v3783_v58  ;;  %v3502_v58 = vld [vmem:[#allocation8 + $0x30] sm:$0xff]  }
 0x21a   : > { %1619 = vmatprep.subr.bf16.mxu1 %v3470_v4  ;;  %3072 = vmatpush3.bf16.msra.mxu0 %v3502_v58  ;;  %v3512_v4 = vld [vmem:[#allocation8 + $0x108] sm:$0xff]   ;;  %v1366_v58 = vsub.s32 3, %v4109_v39 }
 0x21b   : > { %3073 = vmatprep.subr.bf16.mxu0 %v3503_v18 }
 0x21d   : > { %1620 = vmatpush1.bf16.msra.mxu1 %v3468_v5  ;;  %v3514_v5 = vld [vmem:[#allocation8 + $0x150] sm:$0xff]  }
 0x21e   : > { %1621 = vmatprep.subr.bf16.mxu1 %v3473_v6  ;;  %3074 = vmatpush3.bf16.msra.mxu0 %v3504_v19  ;;  %v3516_v6 = vld [vmem:[#allocation8 + $0x110] sm:$0xff]   ;;  %v1387_v19 = vrot.slane %v4127_v15, %v1354_v40  ;;  %v3538_v40 = vld [vmem:[#allocation8 + $0x240] sm:$0xff]  }
 0x21f   : > { %3103 = vmatprep.subr.bf16.mxu0 %v3506_v22  ;;  %v3532_v22 = vld [vmem:[#allocation8 + $0x130] sm:$0xff]  }
 0x221   : > { %1622 = vmatpush1.bf16.msra.mxu1 %v3471_v7  ;;  %v3518_v7 = vld [vmem:[#allocation8 + $0x158] sm:$0xff]  }
 0x222   : > { %1623 = vmatprep.subr.bf16.mxu1 %v3476_v9  ;;  %v3520_v9 = vld [vmem:[#allocation8 + $0x118] sm:$0xff]  }
 0x225   : > { %1624 = vmatpush1.bf16.msra.mxu1 %v3474_v10  ;;  %v3522_v10 = vld [vmem:[#allocation8 + $0x160] sm:$0xff]  }
 0x226   : > { %1625 = vmatprep.subr.bf16.mxu1 %v3479_v59  ;;  %v3524_v59 = vld [vmem:[#allocation8 + $0x120] sm:$0xff]  }
 0x229   : > { %1626 = vmatpush1.bf16.msra.mxu1 %v3477_v11  ;;  %v1370_v11 = vsub.s32 4, %v4109_v39 }
 0x22a   : > { %1627 = vmatprep.subr.bf16.mxu1 %v3482_v12  ;;  %v3526_v12 = vld [vmem:[#allocation8 + $0x168] sm:$0xff]  }
 0x22d   : > { %1628 = vmatpush1.bf16.msra.mxu1 %v3480_v13  ;;  %v1362_v13 = vsub.s32 2, %v4109_v39 }
 0x22e   : > { %1629 = vmatprep.subr.bf16.mxu1 %v3485_v14  ;;  %v3528_v14 = vld [vmem:[#allocation8 + $0x128] sm:$0xff]  }
 0x22f   : > { %v1363_v18 = vrot.slane %v4115_v41, %v1362_v13 }
 0x231   : > { %1630 = vmatpush1.bf16.msra.mxu1 %v3483_v16  ;;  %v1371_v16 = vrot.slane %v4115_v41, %v1370_v11  ;;  %v3562_v11 = vld [vmem:[#allocation8 + $0x270] sm:$0xff]  }
 0x232   : > { %1631 = vmatprep.subr.bf16.mxu1 %v3488_v17  ;;  %v3530_v17 = vld [vmem:[#allocation8 + $0x170] sm:$0xff]  }
 0x235   : > { %1632 = vmatpush1.bf16.msra.mxu1 %v3486_v20  ;;  %v1367_v20 = vrot.slane %v4115_v41, %v1366_v58 }
 0x236   : > { %3081 = vmatprep.subr.bf16.mxu1 %v3505_v21  ;;  %v1391_v21 = vrot.slane %v4127_v15, %v1358_v42 }
 0x238   : > { %1650 = vmatmul.mubr.bf16.vlgmr.msra.gmra.mrb[12].mxu1 %v4097_v8  ;;  %v3529_v8 = vld [vmem:[#allocation8 + $0xf0] sm:$0xff]  }
 0x239   : > { %3082 = vmatpush3.bf16.msra.mxu1 %v3507_v23 }
 0x23a   : > { %3083 = vmatprep.subr.bf16.mxu1 %v3509_v24  ;;  %v3534_v24 = vld [vmem:[#allocation8 + $0x178] sm:$0xff]  }
 0x23d   : > { %3084 = vmatpush3.bf16.msra.mxu1 %v3511_v25 }
 0x23e   : > { %3085 = vmatprep.subr.bf16.mxu1 %v3513_v26 }
 0x241   : > { %3086 = vmatpush3.bf16.msra.mxu1 %v3515_v27 }
 0x242   : > { %3087 = vmatprep.subr.bf16.mxu1 %v3517_v28 }
 0x245   : > { %3088 = vmatpush3.bf16.msra.mxu1 %v3519_v29 }
 0x246   : > { %3089 = vmatprep.subr.bf16.mxu1 %v3521_v30 }
 0x249   : > { %3090 = vmatpush3.bf16.msra.mxu1 %v3523_v31 }
 0x24a   : > { %3091 = vmatprep.subr.bf16.mxu1 %v3525_v32 }
 0x24d   : > { %3092 = vmatpush3.bf16.msra.mxu1 %v3527_v33 }
 0x24e   : > { %3093 = vmatprep.subr.bf16.mxu1 %v3529_v8 }
 0x251   : > { %3094 = vmatpush3.bf16.msra.mxu1 %v3531_v34  ;;  %v3536_v34 = vld [vmem:[#allocation8 + $0x138] sm:$0xff]  }
 0x252   : > { %3095 = vmatprep.subr.bf16.mxu1 %v3533_v35 }
 0x255   : > { %3096 = vmatpush3.bf16.msra.mxu1 %v3535_v36 }
 0x256   : > { %3125 = vmatprep.subr.bf16.mxu1 %v3537_v37 }
 0x2ab   : > { %v1446_v47 = vpop.f32.mrb[0].mxu1  ;;  %v1528_v48 = vpop.f32.mrb[32].mxu0 }
 0x2ac   : > { %v1447_v49 = vadd.f32 %v1446_v47, %v1355_v44  ;;  %v1448_v50 = vpop.f32.mrb[1].mxu1  ;;  %v1530_v51 = vpop.f32.mrb[33].mxu0  ;;  %v1529_v23 = vadd.f32 %v1528_v48, %v1371_v16  ;;  %v3563_v16 = vld [vmem:[#allocation8 + $0x1b0] sm:$0xff]  }
 0x2ad   : > { %v1449_v52 = vadd.f32 %v1448_v50, %v1359_v45  ;;  %v1531_v53 = vadd.f32 %v1530_v51, %v1375_v46  ;;  %v1450_v54 = vpop.f32.mrb[2].mxu1  ;;  %v1532_v55 = vpop.f32.mrb[34].mxu0  ;;  %v3539_v45 = vld [vmem:[#allocation8 + $0x180] sm:$0xff]   ;;  %v3542_v50 = vld [vmem:[#allocation8 + $0x248] sm:$0xff]  }
 0x2ae   : > { %v1658_v56 = vmax.f32 %v1447_v49, 0.0  ;;  %v1451_v57 = vpop.f32.mrb[3].mxu1  ;;  %v1533_v60 = vpop.f32.mrb[35].mxu0  ;;  %v1662_v35 = vmax.f32 %v1529_v23, 0.0  ;;  %v3540_v46 = vld [vmem:[#allocation8 + $0x200] sm:$0xff]   ;;  %v3541_v49 = vld [vmem:[#allocation8 + $0x1c8] sm:$0xff]  }
 0x2af   : > { %v1659_v61 = vmax.f32 %v1449_v52, 0.0  ;;  %v1663_v62 = vmax.f32 %v1531_v53, 0.0  ;;  %v3543_v52 = vld [vmem:[#allocation8 + $0x188] sm:$0xff]   ;;  %v3545_v54 = vld [vmem:[#allocation8 + $0x1d0] sm:$0xff]   ;;  %v3549_v60 = vld [vmem:[#allocation8 + $0x1d8] sm:$0xff]  }
 0x2b0   : > { %v1670_v1 = vpack.c.bf16 %v1658_v56, %v1658_v56  ;;  %v1674_v47 = vpack.c.bf16 %v1662_v35, %v1662_v35  ;;  %v3544_v53 = vld [vmem:[#allocation8 + $0x208] sm:$0xff]   ;;  %v3546_v55 = vld [vmem:[#allocation8 + $0x250] sm:$0xff]  }
 0x2b1   : > { %v1671_v63 = vpack.c.bf16 %v1659_v61, %v1659_v61  ;;  %v1675_v3 = vpack.c.bf16 %v1663_v62, %v1663_v62  ;;  %v3547_v56 = vld [vmem:[#allocation8 + $0x190] sm:$0xff]   ;;  %v3550_v61 = vld [vmem:[#allocation8 + $0x258] sm:$0xff]   ;;  %v3571_v35 = vld [vmem:[#allocation8 + $0x2c8] sm:$0xff]  }
 0x2b2   : > { %v3548_v57 = vld [vmem:[#allocation8 + $0x210] sm:$0xff]   ;;  %v3551_v62 = vld [vmem:[#allocation8 + $0x198] sm:$0xff]  }
 0x2b3   : > { %2483 = vmatprep.mubr.bf16.mxu0 %v1671_v63  ;;  %v3552_v63 = vld [vmem:[#allocation8 + $0x218] sm:$0xff]  }
 0x2b4   : > { %2484 = vmatmul.mubr.bf16.vlgmr.msra.gmra.mrb[40].mxu0 %v1670_v1  ;;  %v3554_v1 = vld [vmem:[#allocation8 + $0x260] sm:$0xff]  }
 0x2b5   : > { %3104 = vmatpush3.bf16.msra.mxu0 %v3508_v0  ;;  %2563 = vmatprep.mubr.bf16.mxu0 %v1675_v3  ;;  %v3553_v0 = vld [vmem:[#allocation8 + $0x1e0] sm:$0xff]  }
 0x2b6   : > { %3105 = vmatprep.subr.bf16.mxu0 %v3510_v2  ;;  %v3555_v2 = vld [vmem:[#allocation8 + $0x1a0] sm:$0xff]  }
 0x2b7   : > { %v3556_v3 = vld [vmem:[#allocation8 + $0x220] sm:$0xff]  }
 0x2b9   : > { %3106 = vmatpush3.bf16.msra.mxu0 %v3512_v4  ;;  %v3557_v4 = vld [vmem:[#allocation8 + $0x1e8] sm:$0xff]  }
 0x2ba   : > { %3107 = vmatprep.subr.bf16.mxu0 %v3514_v5  ;;  %v3558_v5 = vld [vmem:[#allocation8 + $0x268] sm:$0xff]  }
 0x2bd   : > { %3108 = vmatpush3.bf16.msra.mxu0 %v3516_v6  ;;  %v1378_v6 = vsub.s32 6, %v4109_v39 }
 0x2be   : > { %3109 = vmatprep.subr.bf16.mxu0 %v3518_v7  ;;  %v3559_v7 = vld [vmem:[#allocation8 + $0x1a8] sm:$0xff]  }
 0x2c1   : > { %3110 = vmatpush3.bf16.msra.mxu0 %v3520_v9  ;;  %v3560_v9 = vld [vmem:[#allocation8 + $0x228] sm:$0xff]  }
 0x2c2   : > { %3111 = vmatprep.subr.bf16.mxu0 %v3522_v10  ;;  %v1382_v10 = vsub.s32 7, %v4109_v39 }
 0x2c5   : > { %3112 = vmatpush3.bf16.msra.mxu0 %v3524_v59  ;;  %v3561_v59 = vld [vmem:[#allocation8 + $0x1f0] sm:$0xff]  }
 0x2c6   : > { %3113 = vmatprep.subr.bf16.mxu0 %v3526_v12  ;;  %v1379_v12 = vrot.slane %v4115_v41, %v1378_v6 }
 0x2c9   : > { %3114 = vmatpush3.bf16.msra.mxu0 %v3528_v14  ;;  %v1383_v14 = vrot.slane %v4115_v41, %v1382_v10  ;;  %v3569_v41 = vld [vmem:[#allocation8 + $0x2c0] sm:$0xff]  }
 0x2ca   : > { %3115 = vmatprep.subr.bf16.mxu0 %v3530_v17  ;;  %v3564_v17 = vld [vmem:[#allocation8 + $0x230] sm:$0xff]  }
 0x2cb   : > { %v1487_v25 = vpop.f32.mrb[4].mxu1  ;;  %v1610_v26 = vpop.f32.mrb[36].mxu0 }
 0x2cc   : > { %v1488_v27 = vadd.f32 %v1487_v25, %v1363_v18  ;;  %v4139_v28 = vadd.f32 %v1610_v26, %v1387_v19  ;;  %v1489_v29 = vpop.f32.mrb[5].mxu1  ;;  %v1612_v30 = vpop.f32.mrb[37].mxu0  ;;  %v3565_v18 = vld [vmem:[#allocation8 + $0x1f8] sm:$0xff]  }
 0x2cd   : > { %v1490_v31 = vadd.f32 %v1489_v29, %v1367_v20  ;;  %v1613_v32 = vadd.f32 %v1612_v30, %v1391_v21  ;;  %v1491_v33 = vpop.f32.mrb[6].mxu1  ;;  %v1614_v8 = vpop.f32.mrb[38].mxu0  ;;  %3116 = vmatpush3.bf16.msra.mxu0 %v3532_v22  ;;  %v3566_v19 = vld [vmem:[#allocation8 + $0x278] sm:$0xff]  }
 0x2ce   : > { %v1660_v36 = vmax.f32 %v1488_v27, 0.0  ;;  %v1492_v37 = vpop.f32.mrb[7].mxu1  ;;  %v1615_v38 = vpop.f32.mrb[39].mxu0  ;;  %3117 = vmatprep.subr.bf16.mxu0 %v3534_v24  ;;  %v3567_v25 = vld [vmem:[#allocation8 + $0x1b8] sm:$0xff]   ;;  %v1666_v27 = vmax.f32 %v4139_v28, 0.0  ;;  %v3570_v33 = vld [vmem:[#allocation8 + $0x280] sm:$0xff]  }
 0x2cf   : > { %v1661_v42 = vmax.f32 %v1490_v31, 0.0  ;;  %v1667_v43 = vmax.f32 %v1613_v32, 0.0  ;;  %v3568_v26 = vld [vmem:[#allocation8 + $0x238] sm:$0xff]   ;;  %v3573_v28 = vld [vmem:[#allocation8 + $0x2d0] sm:$0xff]  }
 0x2d0   : > { %v1672_v48 = vpack.c.bf16 %v1660_v36, %v1660_v36  ;;  %v1678_v8 = vpack.c.bf16 %v1666_v27, %v1666_v27  ;;  %v3572_v36 = vld [vmem:[#allocation8 + $0x288] sm:$0xff]   ;;  %v3574_v37 = vld [vmem:[#allocation8 + $0x290] sm:$0xff]   ;;  %v3575_v38 = vld [vmem:[#allocation8 + $0x2d8] sm:$0xff]  }
 0x2d1   : > { %v1673_v44 = vpack.c.bf16 %v1661_v42, %v1661_v42  ;;  %3118 = vmatpush3.bf16.msra.mxu0 %v3536_v34  ;;  %v1679_v51 = vpack.c.bf16 %v1667_v43, %v1667_v43  ;;  %v3577_v42 = vld [vmem:[#allocation8 + $0x2e0] sm:$0xff]  }
 0x2d2   : > { %3147 = vmatprep.subr.bf16.mxu0 %v3538_v40  ;;  %v3576_v40 = vld [vmem:[#allocation8 + $0x298] sm:$0xff]   ;;  %v3578_v43 = vld [vmem:[#allocation8 + $0x2a0] sm:$0xff]  }
 0x2d3   : > { %2523 = vmatprep.mubr.bf16.mxu1 %v1673_v44  ;;  %v3579_v44 = vld [vmem:[#allocation8 + $0x2e8] sm:$0xff]  }
 0x2d4   : > { %2524 = vmatmul.mubr.bf16.vlgmr.msra.gmra.mrb[16].mxu1 %v1672_v48  ;;  %2564 = vmatmul.mubr.bf16.vlgmr.msra.gmra.mrb[44].mxu0 %v1674_v47  ;;  %v1395_v47 = vrot.slane %v4127_v15, %v1362_v13  ;;  %v1399_v48 = vrot.slane %v4127_v15, %v1366_v58 }
 0x2d5   : > { %3126 = vmatpush3.bf16.msra.mxu1 %v3539_v45  ;;  %3148 = vmatpush3.bf16.msra.mxu0 %v3540_v46  ;;  %v3580_v45 = vld [vmem:[#allocation8 + $0x2a8] sm:$0xff]   ;;  %v3581_v46 = vld [vmem:[#allocation8 + $0x2f0] sm:$0xff]  }
 0x2d6   : > { %2643 = vmatprep.mubr.bf16.mxu0 %v1679_v51  ;;  %3127 = vmatprep.subr.bf16.mxu1 %v3541_v49  ;;  %v3582_v49 = vld [vmem:[#allocation8 + $0x2b0] sm:$0xff]  }
 0x2d7   : > { %3149 = vmatprep.subr.bf16.mxu0 %v3542_v50  ;;  %v3583_v50 = vld [vmem:[#allocation8 + $0x2f8] sm:$0xff]  }
 0x2d9   : > { %3128 = vmatpush3.bf16.msra.mxu1 %v3543_v52  ;;  %3150 = vmatpush3.bf16.msra.mxu0 %v3544_v53 }
 0x2da   : > { %3129 = vmatprep.subr.bf16.mxu1 %v3545_v54  ;;  %3151 = vmatprep.subr.bf16.mxu0 %v3546_v55 }
 0x2dd   : > { %3130 = vmatpush3.bf16.msra.mxu1 %v3547_v56  ;;  %3152 = vmatpush3.bf16.msra.mxu0 %v3548_v57  ;;  %v3584_v56 = vld [vmem:[#allocation8 + $0x2b8] sm:$0xff]  }
 0x2de   : > { %3131 = vmatprep.subr.bf16.mxu1 %v3549_v60  ;;  %3153 = vmatprep.subr.bf16.mxu0 %v3550_v61 }
 0x2e1   : > { %3132 = vmatpush3.bf16.msra.mxu1 %v3551_v62  ;;  %3154 = vmatpush3.bf16.msra.mxu0 %v3552_v63 }
 0x2e2   : > { %3133 = vmatprep.subr.bf16.mxu1 %v3553_v0  ;;  %3155 = vmatprep.subr.bf16.mxu0 %v3554_v1  ;;  %v1874_v1 = vld [vmem:[%s4210_s6] sm:$0x1] }
 0x2e5   : > { %3134 = vmatpush3.bf16.msra.mxu1 %v3555_v2  ;;  %3156 = vmatpush3.bf16.msra.mxu0 %v3556_v3 }
 0x2e6   : > { %3135 = vmatprep.subr.bf16.mxu1 %v3557_v4  ;;  %3157 = vmatprep.subr.bf16.mxu0 %v3558_v5 }
 0x2e9   : > { %3136 = vmatpush3.bf16.msra.mxu1 %v3559_v7  ;;  %3158 = vmatpush3.bf16.msra.mxu0 %v3560_v9 }
 0x2ea   : > { %3137 = vmatprep.subr.bf16.mxu1 %v3561_v59  ;;  %3159 = vmatprep.subr.bf16.mxu0 %v3562_v11 }
 0x2eb   : > { %v1569_v20 = vpop.f32.mrb[8].mxu1 }
 0x2ec   : > { %v1570_v21 = vadd.f32 %v1569_v20, %v1379_v12  ;;  %v1571_v22 = vpop.f32.mrb[9].mxu1 }
 0x2ed   : > { %v1572_v23 = vadd.f32 %v1571_v22, %v1383_v14  ;;  %v1573_v24 = vpop.f32.mrb[10].mxu1  ;;  %3138 = vmatpush3.bf16.msra.mxu1 %v3563_v16  ;;  %3160 = vmatpush3.bf16.msra.mxu0 %v3564_v17 }
 0x2ee   : > { %v1664_v29 = vmax.f32 %v1570_v21, 0.0  ;;  %v1574_v30 = vpop.f32.mrb[11].mxu1  ;;  %3139 = vmatprep.subr.bf16.mxu1 %v3565_v18  ;;  %3161 = vmatprep.subr.bf16.mxu0 %v3566_v19 }
 0x2ef   : > { %v1665_v31 = vmax.f32 %v1572_v23, 0.0 }
 0x2f0   : > { %v1676_v34 = vpack.c.bf16 %v1664_v29, %v1664_v29 }
 0x2f1   : > { %v1677_v32 = vpack.c.bf16 %v1665_v31, %v1665_v31  ;;  %3140 = vmatpush3.bf16.msra.mxu1 %v3567_v25  ;;  %3162 = vmatpush3.bf16.msra.mxu0 %v3568_v26 }
 0x2f2   : > { %3169 = vmatprep.subr.bf16.mxu1 %v3569_v41 }
 0x2f3   : > { %2603 = vmatprep.mubr.bf16.mxu1 %v1677_v32 }
 0x2f4   : > { %2604 = vmatmul.mubr.bf16.vlgmr.msra.gmra.mrb[20].mxu1 %v1676_v34  ;;  %2644 = vmatmul.mubr.bf16.vlgmr.msra.gmra.mrb[48].mxu0 %v1678_v8 }
 0x2f5   : > { %3170 = vmatpush3.bf16.msra.mxu1 %v3570_v33 }
 0x2f6   : > { %3171 = vmatprep.subr.bf16.mxu1 %v3571_v35 }
 0x2f9   : > { %3172 = vmatpush3.bf16.msra.mxu1 %v3572_v36 }
 0x2fa   : > { %3173 = vmatprep.subr.bf16.mxu1 %v3573_v28 }
 0x2fd   : > { %3174 = vmatpush3.bf16.msra.mxu1 %v3574_v37 }
 0x2fe   : > { %3175 = vmatprep.subr.bf16.mxu1 %v3575_v38 }
 0x301   : > { %3176 = vmatpush3.bf16.msra.mxu1 %v3576_v40 }
 0x302   : > { %3177 = vmatprep.subr.bf16.mxu1 %v3577_v42 }
 0x305   : > { %3178 = vmatpush3.bf16.msra.mxu1 %v3578_v43 }
 0x306   : > { %3179 = vmatprep.subr.bf16.mxu1 %v3579_v44 }
 0x309   : > { %3180 = vmatpush3.bf16.msra.mxu1 %v3580_v45 }
 0x30a   : > { %3181 = vmatprep.subr.bf16.mxu1 %v3581_v46 }
 0x30b   : > { %v1651_v51 = vpop.f32.mrb[12].mxu1 }
 0x30c   : > { %v1652_v52 = vadd.f32 %v1651_v51, %v1395_v47  ;;  %v1653_v53 = vpop.f32.mrb[13].mxu1 }
 0x30d   : > { %v1654_v54 = vadd.f32 %v1653_v53, %v1399_v48  ;;  %v1655_v55 = vpop.f32.mrb[14].mxu1  ;;  %3182 = vmatpush3.bf16.msra.mxu1 %v3582_v49 }
 0x30e   : > { %v1668_v57 = vmax.f32 %v1652_v52, 0.0  ;;  %v1656_v60 = vpop.f32.mrb[15].mxu1  ;;  %3183 = vmatprep.subr.bf16.mxu1 %v3583_v50 }
 0x30f   : > { %v1669_v61 = vmax.f32 %v1654_v54, 0.0 }
 0x310   : > { %v1680_v62 = vpack.c.bf16 %v1668_v57, %v1668_v57 }
 0x311   : > { %v1681_v13 = vpack.c.bf16 %v1669_v61, %v1669_v61  ;;  %3184 = vmatpush3.bf16.msra.mxu1 %v3584_v56 }
 0x313   : > { %2683 = vmatprep.mubr.bf16.mxu1 %v1681_v13 }
 0x314   : > { %2684 = vmatmul.mubr.bf16.vlgmr.msra.gmra.mrb[24].mxu1 %v1680_v62 }
 0x387   : > { %v3075_v39 = vpop.f32.mrb[40].mxu0 }
 0x388   : > { %v3076_v15 = vpop.f32.mrb[41].mxu0 }
 0x389   : > { %v3077_v58 = vadd.f32 %v3076_v15, %v3075_v39  ;;  %v3078_v63 = vpop.f32.mrb[42].mxu0 }
 0x38a   : > { %v3079_v0 = vpop.f32.mrb[43].mxu0 }
 0x38b   : > { %v2486_v6 = vadd.f32 %v3077_v58, %v1874_v1 }
 0x3a7   : > { %v3097_v2 = vpop.f32.mrb[16].mxu1  ;;  %v3119_v3 = vpop.f32.mrb[44].mxu0 }
 0x3a8   : > { %v3098_v4 = vpop.f32.mrb[17].mxu1  ;;  %v3120_v5 = vpop.f32.mrb[45].mxu0 }
 0x3a9   : > { %v3099_v7 = vadd.f32 %v3098_v4, %v3097_v2  ;;  %v3121_v9 = vadd.f32 %v3120_v5, %v3119_v3  ;;  %v3100_v10 = vpop.f32.mrb[18].mxu1  ;;  %v3122_v59 = vpop.f32.mrb[46].mxu0 }
 0x3aa   : > { %v3101_v11 = vpop.f32.mrb[19].mxu1  ;;  %v3123_v12 = vpop.f32.mrb[47].mxu0 }
 0x3ab   : > { %v2526_v14 = vadd.f32 %v3099_v7, %v2486_v6 }
 0x3ad   : > { %v2566_v16 = vadd.f32 %v3121_v9, %v2526_v14 }
 0x3c7   : > { %v3141_v17 = vpop.f32.mrb[20].mxu1  ;;  %v3163_v18 = vpop.f32.mrb[48].mxu0 }
 0x3c8   : > { %v3142_v19 = vpop.f32.mrb[21].mxu1  ;;  %v3164_v20 = vpop.f32.mrb[49].mxu0 }
 0x3c9   : > { %v3143_v21 = vadd.f32 %v3142_v19, %v3141_v17  ;;  %v3165_v22 = vadd.f32 %v3164_v20, %v3163_v18  ;;  %v3144_v23 = vpop.f32.mrb[22].mxu1  ;;  %v3166_v24 = vpop.f32.mrb[50].mxu0 }
 0x3ca   : > { %v3145_v25 = vpop.f32.mrb[23].mxu1  ;;  %v3167_v26 = vpop.f32.mrb[51].mxu0 }
 0x3cb   : > { %v2606_v27 = vadd.f32 %v3143_v21, %v2566_v16 }
 0x3cd   : > { %v2646_v29 = vadd.f32 %v3165_v22, %v2606_v27 }
 0x3e7   : > { %v3185_v30 = vpop.f32.mrb[24].mxu1 }
 0x3e8   : > { %v3186_v41 = vpop.f32.mrb[25].mxu1 }
 0x3e9   : > { %v3187_v31 = vadd.f32 %v3186_v41, %v3185_v30  ;;  %v3188_v32 = vpop.f32.mrb[26].mxu1 }
 0x3ea   : > { %v3189_v33 = vpop.f32.mrb[27].mxu1 }
 0x3eb   : > { %v2686_v8 = vadd.f32 %v3187_v31, %v2646_v29 }
 0x3ed   : > { %2691 = vst [vmem:[%s339_s11] sm:$0x1] %v2686_v8 }
 0x3ee   : > { %3712 = shalt.err (!%p3709_p4)
}
 0x3ef   : > { %s3713_s20 = scalar_lea.hbm %s4160_s22, 16  ;;  %s3717_s14 = scalar_lea.hbm %s4211_s7, 32 }
 0x3f0   : > { %p3714_p9 = scmp.ne.s32.totalorder %s4160_s22, %s3713_s20  ;;  %p3718_p8 = scmp.lt.u32.totalorder %s4160_s22, %s4211_s7 }
 0x3f1   : > { %p3719_p13 = scmp.lt.u32.totalorder %s3717_s14, %s3713_s20  ;;  %p3721_p10 = scmp.lt.u32.totalorder %s3713_s20, %s4160_s22 }
 0x3f2   : > { %p3715_p0 = pnand %p3714_p9, %p3973_p5 }
 0x3f3   : > { %p3720_p6 = por %p3719_p13, %p3718_p8 }
 0x3f4   : > { %p3716_p11 = pneg %p3715_p0 }
 0x3f5   : > { %p3722_p3 = por %p3721_p10, %p3720_p6 }
 0x3f7   : > { %p3723_p7 = pnand %p3722_p3, %p3716_p11 }
 0x3f9   : > { %3726 = shalt.err (!%p3723_p7)
}
 0x3fa   : > { %3253 = dma.vmem_to_hbm [thread:$0]  (%p3973_p5), %s4162_s12, 16, %s4160_s22, %s2693_s23  }
 0x3fb PF: > { %s4239_s16 = sld [smem:[#allocation15_spill]]  ;;  %s2717_s11 = sand.u32 1, %s3761_s24  }
 0x3fc   : > { %p4241_p1 = scmp.ge.s32.totalorder %s3773_s27, 2  ;;  %s2718_s17 = scalar_lea.sflag [#allocation4], %s2717_s11 }
 0x401   : > { %p4240_p12 = scmp.ne.s32.totalorder %s4239_s16, 0 }
 0x403   : > { %p3270_p2 = pnand %p4241_p1, %p4240_p12 }
 0x405   : > { %3756 = dma.done.wait (!%p3270_p2), %s2718_s17, 16  }
 0x406   : > { %3758 = vsyncadd (!%p3270_p2), %s2718_s17, 4294967280  ;;  %p22_p4 = scmp.ge.s32.totalorder %s3938_s21, 4   ;;  %s4242_s24 = smov %s3765_s25 }
 0x407   : > { %s4243_s25 = smov %s3769_s26  ;;  %s4244_s26 = smov %s3969_s13 }
 0x408   : > { %s4245_s27 = smov %s3938_s21  ;;  %24 = sbr.rel (!%p22_p4) target bundleno = 9 (0x9), region = 105 }
 0x40f   :  { %2722 = vsyncpa [#allocation3], 1 }
 0x410   :  { %2724 = vsyncpa [#allocation3 + $0x1], 1 }
 0x411   :  { %2725 = vsyncpa [#allocation6], 1 }
 0x412   :  { %2726 = vsyncpa [#allocation9], 1 }
 0x413   :  { %2727 = vsyncpa [#allocation4], 1 }
 0x414   :  { %2729 = vsyncpa [#allocation4 + $0x1], 1 }

</bundles_post_ra>
